<compile_context>
chip_gen: v5e
topology: v5e:2x2
jax: 0.10.0
libtpu: 0.0.40
codegen_flags: <defaults>
</compile_context>

<pallas_src>
import jax
import jax.numpy as jnp
from jax.experimental import pallas as pl
from jax.experimental.pallas import tpu as pltpu

EPS = 1e-5
KSIZE = 3


def genblock_forward_impl(x_nchw, w_oihw, bias, gamma, beta):
    n, c, h, w = x_nchw.shape
    cout, cin, kh, kw = w_oihw.shape
    assert kh == kw == KSIZE
    assert c == cin == cout, "conv1 is applied twice -> in_channels must equal 64"
    h1, w1 = h - kh + 1, w - kw + 1
    assert h1 - kh + 1 == 1 and w1 - kw + 1 == 1, \
        "torch.add broadcast requires 5x5 spatial input"
    del bias  # exactly cancelled by training-mode BN mean subtraction

    N, C, H, W = n, c, h, w
    H1, W1 = h1, w1
    R = H1 * W1          # conv #1 output pixels per batch (== KSIZE*KSIZE here)
    K = KSIZE

    def kernel(x_ref, w_ref, gb_ref, out_ref, xt_s, lhs1_s, a1_s):
        # x_ref  : (N*C, H*W)  flattened-NCHW input (free bitcast view)
        # w_ref  : (K*K*C, C)  conv1 weight, rows (kh, kw, cin)-major, cols cout
        # gb_ref : (2, C)      row 0 = bn1 gamma, row 1 = bn1 beta
        # out_ref: (N*C, H*W)  flattened-NCHW output
        # xt_s   : (H*W, N*C)  VMEM scratch: input with channels on lanes
        # lhs1_s : (N*R, K*K*C) VMEM scratch: im2col matrix for conv #1
        # a1_s   : (N*R, C)     VMEM scratch: relu(bn(conv1)) activations
        gamma_v = gb_ref[0:1, :]          # (1, C)
        beta_v = gb_ref[1:2, :]           # (1, C)

        # ---- NCHW -> channels-on-lanes relayout, fused into the kernel --------
        # One XLU transpose of the whole ~13 KB slab replaces the two HLO
        # NCHW<->NHWC transposes (and their dispatches) of the previous version.
        xt_s[...] = jnp.transpose(x_ref[...])          # (H*W, N*C)

        # ---- conv #1: im2col into VMEM scratch, then one MXU matmul ------------
        # Row (n, oi, oj) of lhs1 holds the 3x3xC patch laid out (kh, kw, cin)-major
        # along lanes, matching w_ref's row order.  Each copy is a static-offset
        # (W1, C) load + masked store (no concat trees, no long live values).
        for bn_ in range(N):
            for oi in range(H1):
                dst = bn_ * R + oi * W1
                for ki in range(K):
                    for kj in range(K):
                        t = ki * K + kj
                        src = (oi + ki) * W + kj
                        lhs1_s[dst:dst + W1, t * C:(t + 1) * C] = \
                            xt_s[src:src + W1, bn_ * C:(bn_ + 1) * C]
        h1 = jnp.dot(lhs1_s[...], w_ref[...],
                     preferred_element_type=jnp.float32)         # (N*R, C)

        # ---- bn1 (training mode: batch stats, biased variance) + ReLU ----------
        cnt1 = float(N * R)
        mean1 = jnp.sum(h1, axis=0, keepdims=True) / cnt1
        var1 = jnp.sum((h1 - mean1) ** 2, axis=0, keepdims=True) / cnt1
        scale1 = gamma_v * jax.lax.rsqrt(var1 + EPS)
        a1_s[...] = jnp.maximum((h1 - mean1) * scale1 + beta_v, 0.0)

        # ---- conv #2 (1x1 output => full contraction) ---------------------------
        # h2[n] = sum_r a1[n, r, :] @ W_r.  Pixel r of the 3x3 activation map pairs
        # with weight tap r of the same 3x3 kernel because H1*W1 == K*K (9 == 9),
        # guaranteed by the wrapper's 5x5-input assert.
        h2 = jnp.zeros((N, C), jnp.float32)
        for r in range(R):
            lhs_r = jnp.concatenate(
                [a1_s[bn_ * R + r:bn_ * R + r + 1, :] for bn_ in range(N)],
                axis=0)                                          # (N, C)
            h2 = h2 + jnp.dot(lhs_r, w_ref[r * C:(r + 1) * C, :],
                              preferred_element_type=jnp.float32)

        # ---- bn1 again (stats over the N 1x1 outputs) ---------------------------
        cnt2 = float(N)
        mean2 = jnp.sum(h2, axis=0, keepdims=True) / cnt2
        var2 = jnp.sum((h2 - mean2) ** 2, axis=0, keepdims=True) / cnt2
        scale2 = gamma_v * jax.lax.rsqrt(var2 + EPS)
        y2 = (h2 - mean2) * scale2 + beta_v                      # (N, C)

        # ---- residual add, written straight back in flattened-NCHW layout -------
        y2t = jnp.transpose(y2)                                  # (C, N): channels on sublanes
        for bn_ in range(N):
            out_ref[bn_ * C:(bn_ + 1) * C, :] = (
                x_ref[bn_ * C:(bn_ + 1) * C, :] + y2t[:, bn_:bn_ + 1])

    # -------- wrapper-side data prep: free bitcasts + static weight packing -------
    x2d = x_nchw.reshape(N * C, H * W).astype(jnp.float32)       # free (contiguous) view
    # Weight relayout OIHW -> (kh*kw*cin, cout): static model state in a real
    # network, pre-packed once (tiny one-time HLO transpose of ~147 KB).
    w_flat = jnp.transpose(w_oihw, (2, 3, 1, 0)).reshape(K * K * C, C).astype(jnp.float32)
    gb = jnp.stack([gamma, beta]).astype(jnp.float32)            # (2, C): one operand/DMA

    out2d = pl.pallas_call(
        kernel,
        out_shape=jax.ShapeDtypeStruct((N * C, H * W), jnp.float32),
        in_specs=[pl.BlockSpec(memory_space=pltpu.MemorySpace.VMEM)] * 3,
        out_specs=pl.BlockSpec(memory_space=pltpu.MemorySpace.VMEM),
        scratch_shapes=[
            pltpu.VMEM((H * W, N * C), jnp.float32),             # xt_s
            pltpu.VMEM((N * R, K * K * C), jnp.float32),         # lhs1_s (im2col)
            pltpu.VMEM((N * R, C), jnp.float32),                 # a1_s
        ],
    )(x2d, w_flat, gb)

    return out2d.reshape(N, C, H, W)                             # free (contiguous) view


genblock_forward = jax.jit(genblock_forward_impl)


def reference_forward(x_nchw, w_oihw, bias, gamma, beta):
    """Pure-JAX reference mirroring the PyTorch forward (training-mode BN)."""
    def conv(v):
        return jax.lax.conv_general_dilated(
            v, w_oihw, window_strides=(1, 1), padding="VALID",
            dimension_numbers=("NCHW", "OIHW", "NCHW")) + bias.reshape(1, -1, 1, 1)

    def bn(v):
        mean = jnp.mean(v, axis=(0, 2, 3), keepdims=True)
        var = jnp.mean((v - mean) ** 2, axis=(0, 2, 3), keepdims=True)
        return ((v - mean) * jax.lax.rsqrt(var + EPS) * gamma.reshape(1, -1, 1, 1)
                + beta.reshape(1, -1, 1, 1))

    h = jnp.maximum(bn(conv(x_nchw)), 0.0)
    h = bn(conv(h))
    return h + x_nchw        # (N,C,1,1) + (N,C,H,W) broadcast, matching torch.add


if __name__ == "__main__":
    N, C, H, W = 2, 64, 5, 5          # in_channels must be 64; spatial 5x5 (see header)
    key = jax.random.PRNGKey(0)
    k1, k2, k3 = jax.random.split(key, 3)

    x_nchw = jax.random.normal(k1, (N, C, H, W), jnp.float32)
    # conv1 parameters in native PyTorch layout (Cout, Cin, KH, KW).
    w_oihw = jax.random.normal(k2, (C, C, KSIZE, KSIZE), jnp.float32) * 0.05
    bias = jax.random.normal(k3, (C,), jnp.float32) * 0.05
    # bn1 parameters (PyTorch BatchNorm2d default init).
    gamma = jnp.ones((C,), jnp.float32)
    beta = jnp.zeros((C,), jnp.float32)

    out = genblock_forward(x_nchw, w_oihw, bias, gamma, beta)
    out = jax.block_until_ready(out)
    assert out.shape == (N, C, H, W)

    ref = reference_forward(x_nchw, w_oihw, bias, gamma, beta)
    if not jnp.allclose(out, ref, atol=1e-2, rtol=1e-2):
        max_err = float(jnp.max(jnp.abs(out - ref)))
        raise AssertionError(f"Pallas output mismatch vs reference, max abs err = {max_err}")

    print("KERNEL_OK")
</pallas_src>

<mosaic_0001>
module attributes {stable_mosaic.version = 11 : i64} {
  func.func @kernel(%arg0: memref<128x25xf32, #tpu.memory_space<vmem>>, %arg1: memref<576x64xf32, #tpu.memory_space<vmem>>, %arg2: memref<2x64xf32, #tpu.memory_space<vmem>>, %arg3: memref<128x25xf32, #tpu.memory_space<vmem>>, %arg4: memref<25x128xf32, #tpu.memory_space<vmem>>, %arg5: memref<18x576xf32, #tpu.memory_space<vmem>>, %arg6: memref<18x64xf32, #tpu.memory_space<vmem>>) attributes {dimension_semantics = [], scalar_prefetch = 0 : i64, scratch_operands = 3 : i64, tpu.core_type = #tpu.core_type<tc>} {
    %c0 = arith.constant 0 : index
    %c0_0 = arith.constant 0 : index
    %0 = vector.load %arg2[%c0, %c0_0] : memref<2x64xf32, #tpu.memory_space<vmem>>, vector<1x64xf32>
    %c1 = arith.constant 1 : index
    %c0_1 = arith.constant 0 : index
    %1 = vector.load %arg2[%c1, %c0_1] : memref<2x64xf32, #tpu.memory_space<vmem>>, vector<1x64xf32>
    %c0_2 = arith.constant 0 : index
    %c0_3 = arith.constant 0 : index
    %2 = vector.load %arg0[%c0_2, %c0_3] : memref<128x25xf32, #tpu.memory_space<vmem>>, vector<128x25xf32>
    %3 = tpu.transpose %2, [1, 0] : vector<128x25xf32> -> vector<25x128xf32>
    %c0_4 = arith.constant 0 : index
    %c0_5 = arith.constant 0 : index
    %4 = vector.load %arg4[%c0_4, %c0_5] : memref<25x128xf32, #tpu.memory_space<vmem>>, vector<25x128xf32>
    tpu.vector_store %arg4[%c0_4, %c0_5], %3 {strides = array<i32>} : memref<25x128xf32, #tpu.memory_space<vmem>>, vector<25x128xf32>,
    %c0_6 = arith.constant 0 : index
    %c0_7 = arith.constant 0 : index
    %5 = vector.load %arg4[%c0_6, %c0_7] : memref<25x128xf32, #tpu.memory_space<vmem>>, vector<3x64xf32>
    %c0_8 = arith.constant 0 : index
    %c0_9 = arith.constant 0 : index
    %6 = vector.load %arg5[%c0_8, %c0_9] : memref<18x576xf32, #tpu.memory_space<vmem>>, vector<3x64xf32>
    tpu.vector_store %arg5[%c0_8, %c0_9], %5 {strides = array<i32>} : memref<18x576xf32, #tpu.memory_space<vmem>>, vector<3x64xf32>,
    %c1_10 = arith.constant 1 : index
    %c0_11 = arith.constant 0 : index
    %7 = vector.load %arg4[%c1_10, %c0_11] : memref<25x128xf32, #tpu.memory_space<vmem>>, vector<3x64xf32>
    %c0_12 = arith.constant 0 : index
    %c64 = arith.constant 64 : index
    %8 = vector.load %arg5[%c0_12, %c64] : memref<18x576xf32, #tpu.memory_space<vmem>>, vector<3x64xf32>
    tpu.vector_store %arg5[%c0_12, %c64], %7 {strides = array<i32>} : memref<18x576xf32, #tpu.memory_space<vmem>>, vector<3x64xf32>,
    %c2 = arith.constant 2 : index
    %c0_13 = arith.constant 0 : index
    %9 = vector.load %arg4[%c2, %c0_13] : memref<25x128xf32, #tpu.memory_space<vmem>>, vector<3x64xf32>
    %c0_14 = arith.constant 0 : index
    %c128 = arith.constant 128 : index
    %10 = vector.load %arg5[%c0_14, %c128] : memref<18x576xf32, #tpu.memory_space<vmem>>, vector<3x64xf32>
    tpu.vector_store %arg5[%c0_14, %c128], %9 {strides = array<i32>} : memref<18x576xf32, #tpu.memory_space<vmem>>, vector<3x64xf32>,
    %c5 = arith.constant 5 : index
    %c0_15 = arith.constant 0 : index
    %11 = vector.load %arg4[%c5, %c0_15] : memref<25x128xf32, #tpu.memory_space<vmem>>, vector<3x64xf32>
    %c0_16 = arith.constant 0 : index
    %c192 = arith.constant 192 : index
    %12 = vector.load %arg5[%c0_16, %c192] : memref<18x576xf32, #tpu.memory_space<vmem>>, vector<3x64xf32>
    tpu.vector_store %arg5[%c0_16, %c192], %11 {strides = array<i32>} : memref<18x576xf32, #tpu.memory_space<vmem>>, vector<3x64xf32>,
    %c6 = arith.constant 6 : index
    %c0_17 = arith.constant 0 : index
    %13 = vector.load %arg4[%c6, %c0_17] : memref<25x128xf32, #tpu.memory_space<vmem>>, vector<3x64xf32>
    %c0_18 = arith.constant 0 : index
    %c256 = arith.constant 256 : index
    %14 = vector.load %arg5[%c0_18, %c256] : memref<18x576xf32, #tpu.memory_space<vmem>>, vector<3x64xf32>
    tpu.vector_store %arg5[%c0_18, %c256], %13 {strides = array<i32>} : memref<18x576xf32, #tpu.memory_space<vmem>>, vector<3x64xf32>,
    %c7 = arith.constant 7 : index
    %c0_19 = arith.constant 0 : index
    %15 = vector.load %arg4[%c7, %c0_19] : memref<25x128xf32, #tpu.memory_space<vmem>>, vector<3x64xf32>
    %c0_20 = arith.constant 0 : index
    %c320 = arith.constant 320 : index
    %16 = vector.load %arg5[%c0_20, %c320] : memref<18x576xf32, #tpu.memory_space<vmem>>, vector<3x64xf32>
    tpu.vector_store %arg5[%c0_20, %c320], %15 {strides = array<i32>} : memref<18x576xf32, #tpu.memory_space<vmem>>, vector<3x64xf32>,
    %c10 = arith.constant 10 : index
    %c0_21 = arith.constant 0 : index
    %17 = vector.load %arg4[%c10, %c0_21] : memref<25x128xf32, #tpu.memory_space<vmem>>, vector<3x64xf32>
    %c0_22 = arith.constant 0 : index
    %c384 = arith.constant 384 : index
    %18 = vector.load %arg5[%c0_22, %c384] : memref<18x576xf32, #tpu.memory_space<vmem>>, vector<3x64xf32>
    tpu.vector_store %arg5[%c0_22, %c384], %17 {strides = array<i32>} : memref<18x576xf32, #tpu.memory_space<vmem>>, vector<3x64xf32>,
    %c11 = arith.constant 11 : index
    %c0_23 = arith.constant 0 : index
    %19 = vector.load %arg4[%c11, %c0_23] : memref<25x128xf32, #tpu.memory_space<vmem>>, vector<3x64xf32>
    %c0_24 = arith.constant 0 : index
    %c448 = arith.constant 448 : index
    %20 = vector.load %arg5[%c0_24, %c448] : memref<18x576xf32, #tpu.memory_space<vmem>>, vector<3x64xf32>
    tpu.vector_store %arg5[%c0_24, %c448], %19 {strides = array<i32>} : memref<18x576xf32, #tpu.memory_space<vmem>>, vector<3x64xf32>,
    %c12 = arith.constant 12 : index
    %c0_25 = arith.constant 0 : index
    %21 = vector.load %arg4[%c12, %c0_25] : memref<25x128xf32, #tpu.memory_space<vmem>>, vector<3x64xf32>
    %c0_26 = arith.constant 0 : index
    %c512 = arith.constant 512 : index
    %22 = vector.load %arg5[%c0_26, %c512] : memref<18x576xf32, #tpu.memory_space<vmem>>, vector<3x64xf32>
    tpu.vector_store %arg5[%c0_26, %c512], %21 {strides = array<i32>} : memref<18x576xf32, #tpu.memory_space<vmem>>, vector<3x64xf32>,
    %c5_27 = arith.constant 5 : index
    %c0_28 = arith.constant 0 : index
    %23 = vector.load %arg4[%c5_27, %c0_28] : memref<25x128xf32, #tpu.memory_space<vmem>>, vector<3x64xf32>
    %c3 = arith.constant 3 : index
    %c0_29 = arith.constant 0 : index
    %24 = vector.load %arg5[%c3, %c0_29] : memref<18x576xf32, #tpu.memory_space<vmem>>, vector<3x64xf32>
    tpu.vector_store %arg5[%c3, %c0_29], %23 {strides = array<i32>} : memref<18x576xf32, #tpu.memory_space<vmem>>, vector<3x64xf32>,
    %c6_30 = arith.constant 6 : index
    %c0_31 = arith.constant 0 : index
    %25 = vector.load %arg4[%c6_30, %c0_31] : memref<25x128xf32, #tpu.memory_space<vmem>>, vector<3x64xf32>
    %c3_32 = arith.constant 3 : index
    %c64_33 = arith.constant 64 : index
    %26 = vector.load %arg5[%c3_32, %c64_33] : memref<18x576xf32, #tpu.memory_space<vmem>>, vector<3x64xf32>
    tpu.vector_store %arg5[%c3_32, %c64_33], %25 {strides = array<i32>} : memref<18x576xf32, #tpu.memory_space<vmem>>, vector<3x64xf32>,
    %c7_34 = arith.constant 7 : index
    %c0_35 = arith.constant 0 : index
    %27 = vector.load %arg4[%c7_34, %c0_35] : memref<25x128xf32, #tpu.memory_space<vmem>>, vector<3x64xf32>
    %c3_36 = arith.constant 3 : index
    %c128_37 = arith.constant 128 : index
    %28 = vector.load %arg5[%c3_36, %c128_37] : memref<18x576xf32, #tpu.memory_space<vmem>>, vector<3x64xf32>
    tpu.vector_store %arg5[%c3_36, %c128_37], %27 {strides = array<i32>} : memref<18x576xf32, #tpu.memory_space<vmem>>, vector<3x64xf32>,
    %c10_38 = arith.constant 10 : index
    %c0_39 = arith.constant 0 : index
    %29 = vector.load %arg4[%c10_38, %c0_39] : memref<25x128xf32, #tpu.memory_space<vmem>>, vector<3x64xf32>
    %c3_40 = arith.constant 3 : index
    %c192_41 = arith.constant 192 : index
    %30 = vector.load %arg5[%c3_40, %c192_41] : memref<18x576xf32, #tpu.memory_space<vmem>>, vector<3x64xf32>
    tpu.vector_store %arg5[%c3_40, %c192_41], %29 {strides = array<i32>} : memref<18x576xf32, #tpu.memory_space<vmem>>, vector<3x64xf32>,
    %c11_42 = arith.constant 11 : index
    %c0_43 = arith.constant 0 : index
    %31 = vector.load %arg4[%c11_42, %c0_43] : memref<25x128xf32, #tpu.memory_space<vmem>>, vector<3x64xf32>
    %c3_44 = arith.constant 3 : index
    %c256_45 = arith.constant 256 : index
    %32 = vector.load %arg5[%c3_44, %c256_45] : memref<18x576xf32, #tpu.memory_space<vmem>>, vector<3x64xf32>
    tpu.vector_store %arg5[%c3_44, %c256_45], %31 {strides = array<i32>} : memref<18x576xf32, #tpu.memory_space<vmem>>, vector<3x64xf32>,
    %c12_46 = arith.constant 12 : index
    %c0_47 = arith.constant 0 : index
    %33 = vector.load %arg4[%c12_46, %c0_47] : memref<25x128xf32, #tpu.memory_space<vmem>>, vector<3x64xf32>
    %c3_48 = arith.constant 3 : index
    %c320_49 = arith.constant 320 : index
    %34 = vector.load %arg5[%c3_48, %c320_49] : memref<18x576xf32, #tpu.memory_space<vmem>>, vector<3x64xf32>
    tpu.vector_store %arg5[%c3_48, %c320_49], %33 {strides = array<i32>} : memref<18x576xf32, #tpu.memory_space<vmem>>, vector<3x64xf32>,
    %c15 = arith.constant 15 : index
    %c0_50 = arith.constant 0 : index
    %35 = vector.load %arg4[%c15, %c0_50] : memref<25x128xf32, #tpu.memory_space<vmem>>, vector<3x64xf32>
    %c3_51 = arith.constant 3 : index
    %c384_52 = arith.constant 384 : index
    %36 = vector.load %arg5[%c3_51, %c384_52] : memref<18x576xf32, #tpu.memory_space<vmem>>, vector<3x64xf32>
    tpu.vector_store %arg5[%c3_51, %c384_52], %35 {strides = array<i32>} : memref<18x576xf32, #tpu.memory_space<vmem>>, vector<3x64xf32>,
    %c16 = arith.constant 16 : index
    %c0_53 = arith.constant 0 : index
    %37 = vector.load %arg4[%c16, %c0_53] : memref<25x128xf32, #tpu.memory_space<vmem>>, vector<3x64xf32>
    %c3_54 = arith.constant 3 : index
    %c448_55 = arith.constant 448 : index
    %38 = vector.load %arg5[%c3_54, %c448_55] : memref<18x576xf32, #tpu.memory_space<vmem>>, vector<3x64xf32>
    tpu.vector_store %arg5[%c3_54, %c448_55], %37 {strides = array<i32>} : memref<18x576xf32, #tpu.memory_space<vmem>>, vector<3x64xf32>,
    %c17 = arith.constant 17 : index
    %c0_56 = arith.constant 0 : index
    %39 = vector.load %arg4[%c17, %c0_56] : memref<25x128xf32, #tpu.memory_space<vmem>>, vector<3x64xf32>
    %c3_57 = arith.constant 3 : index
    %c512_58 = arith.constant 512 : index
    %40 = vector.load %arg5[%c3_57, %c512_58] : memref<18x576xf32, #tpu.memory_space<vmem>>, vector<3x64xf32>
    tpu.vector_store %arg5[%c3_57, %c512_58], %39 {strides = array<i32>} : memref<18x576xf32, #tpu.memory_space<vmem>>, vector<3x64xf32>,
    %c10_59 = arith.constant 10 : index
    %c0_60 = arith.constant 0 : index
    %41 = vector.load %arg4[%c10_59, %c0_60] : memref<25x128xf32, #tpu.memory_space<vmem>>, vector<3x64xf32>
    %c6_61 = arith.constant 6 : index
    %c0_62 = arith.constant 0 : index
    %42 = vector.load %arg5[%c6_61, %c0_62] : memref<18x576xf32, #tpu.memory_space<vmem>>, vector<3x64xf32>
    tpu.vector_store %arg5[%c6_61, %c0_62], %41 {strides = array<i32>} : memref<18x576xf32, #tpu.memory_space<vmem>>, vector<3x64xf32>,
    %c11_63 = arith.constant 11 : index
    %c0_64 = arith.constant 0 : index
    %43 = vector.load %arg4[%c11_63, %c0_64] : memref<25x128xf32, #tpu.memory_space<vmem>>, vector<3x64xf32>
    %c6_65 = arith.constant 6 : index
    %c64_66 = arith.constant 64 : index
    %44 = vector.load %arg5[%c6_65, %c64_66] : memref<18x576xf32, #tpu.memory_space<vmem>>, vector<3x64xf32>
    tpu.vector_store %arg5[%c6_65, %c64_66], %43 {strides = array<i32>} : memref<18x576xf32, #tpu.memory_space<vmem>>, vector<3x64xf32>,
    %c12_67 = arith.constant 12 : index
    %c0_68 = arith.constant 0 : index
    %45 = vector.load %arg4[%c12_67, %c0_68] : memref<25x128xf32, #tpu.memory_space<vmem>>, vector<3x64xf32>
    %c6_69 = arith.constant 6 : index
    %c128_70 = arith.constant 128 : index
    %46 = vector.load %arg5[%c6_69, %c128_70] : memref<18x576xf32, #tpu.memory_space<vmem>>, vector<3x64xf32>
    tpu.vector_store %arg5[%c6_69, %c128_70], %45 {strides = array<i32>} : memref<18x576xf32, #tpu.memory_space<vmem>>, vector<3x64xf32>,
    %c15_71 = arith.constant 15 : index
    %c0_72 = arith.constant 0 : index
    %47 = vector.load %arg4[%c15_71, %c0_72] : memref<25x128xf32, #tpu.memory_space<vmem>>, vector<3x64xf32>
    %c6_73 = arith.constant 6 : index
    %c192_74 = arith.constant 192 : index
    %48 = vector.load %arg5[%c6_73, %c192_74] : memref<18x576xf32, #tpu.memory_space<vmem>>, vector<3x64xf32>
    tpu.vector_store %arg5[%c6_73, %c192_74], %47 {strides = array<i32>} : memref<18x576xf32, #tpu.memory_space<vmem>>, vector<3x64xf32>,
    %c16_75 = arith.constant 16 : index
    %c0_76 = arith.constant 0 : index
    %49 = vector.load %arg4[%c16_75, %c0_76] : memref<25x128xf32, #tpu.memory_space<vmem>>, vector<3x64xf32>
    %c6_77 = arith.constant 6 : index
    %c256_78 = arith.constant 256 : index
    %50 = vector.load %arg5[%c6_77, %c256_78] : memref<18x576xf32, #tpu.memory_space<vmem>>, vector<3x64xf32>
    tpu.vector_store %arg5[%c6_77, %c256_78], %49 {strides = array<i32>} : memref<18x576xf32, #tpu.memory_space<vmem>>, vector<3x64xf32>,
    %c17_79 = arith.constant 17 : index
    %c0_80 = arith.constant 0 : index
    %51 = vector.load %arg4[%c17_79, %c0_80] : memref<25x128xf32, #tpu.memory_space<vmem>>, vector<3x64xf32>
    %c6_81 = arith.constant 6 : index
    %c320_82 = arith.constant 320 : index
    %52 = vector.load %arg5[%c6_81, %c320_82] : memref<18x576xf32, #tpu.memory_space<vmem>>, vector<3x64xf32>
    tpu.vector_store %arg5[%c6_81, %c320_82], %51 {strides = array<i32>} : memref<18x576xf32, #tpu.memory_space<vmem>>, vector<3x64xf32>,
    %c20 = arith.constant 20 : index
    %c0_83 = arith.constant 0 : index
    %53 = vector.load %arg4[%c20, %c0_83] : memref<25x128xf32, #tpu.memory_space<vmem>>, vector<3x64xf32>
    %c6_84 = arith.constant 6 : index
    %c384_85 = arith.constant 384 : index
    %54 = vector.load %arg5[%c6_84, %c384_85] : memref<18x576xf32, #tpu.memory_space<vmem>>, vector<3x64xf32>
    tpu.vector_store %arg5[%c6_84, %c384_85], %53 {strides = array<i32>} : memref<18x576xf32, #tpu.memory_space<vmem>>, vector<3x64xf32>,
    %c21 = arith.constant 21 : index
    %c0_86 = arith.constant 0 : index
    %55 = vector.load %arg4[%c21, %c0_86] : memref<25x128xf32, #tpu.memory_space<vmem>>, vector<3x64xf32>
    %c6_87 = arith.constant 6 : index
    %c448_88 = arith.constant 448 : index
    %56 = vector.load %arg5[%c6_87, %c448_88] : memref<18x576xf32, #tpu.memory_space<vmem>>, vector<3x64xf32>
    tpu.vector_store %arg5[%c6_87, %c448_88], %55 {strides = array<i32>} : memref<18x576xf32, #tpu.memory_space<vmem>>, vector<3x64xf32>,
    %c22 = arith.constant 22 : index
    %c0_89 = arith.constant 0 : index
    %57 = vector.load %arg4[%c22, %c0_89] : memref<25x128xf32, #tpu.memory_space<vmem>>, vector<3x64xf32>
    %c6_90 = arith.constant 6 : index
    %c512_91 = arith.constant 512 : index
    %58 = vector.load %arg5[%c6_90, %c512_91] : memref<18x576xf32, #tpu.memory_space<vmem>>, vector<3x64xf32>
    tpu.vector_store %arg5[%c6_90, %c512_91], %57 {strides = array<i32>} : memref<18x576xf32, #tpu.memory_space<vmem>>, vector<3x64xf32>,
    %c0_92 = arith.constant 0 : index
    %c64_93 = arith.constant 64 : index
    %59 = vector.load %arg4[%c0_92, %c64_93] : memref<25x128xf32, #tpu.memory_space<vmem>>, vector<3x64xf32>
    %c9 = arith.constant 9 : index
    %c0_94 = arith.constant 0 : index
    %60 = vector.load %arg5[%c9, %c0_94] : memref<18x576xf32, #tpu.memory_space<vmem>>, vector<3x64xf32>
    tpu.vector_store %arg5[%c9, %c0_94], %59 {strides = array<i32>} : memref<18x576xf32, #tpu.memory_space<vmem>>, vector<3x64xf32>,
    %c1_95 = arith.constant 1 : index
    %c64_96 = arith.constant 64 : index
    %61 = vector.load %arg4[%c1_95, %c64_96] : memref<25x128xf32, #tpu.memory_space<vmem>>, vector<3x64xf32>
    %c9_97 = arith.constant 9 : index
    %c64_98 = arith.constant 64 : index
    %62 = vector.load %arg5[%c9_97, %c64_98] : memref<18x576xf32, #tpu.memory_space<vmem>>, vector<3x64xf32>
    tpu.vector_store %arg5[%c9_97, %c64_98], %61 {strides = array<i32>} : memref<18x576xf32, #tpu.memory_space<vmem>>, vector<3x64xf32>,
    %c2_99 = arith.constant 2 : index
    %c64_100 = arith.constant 64 : index
    %63 = vector.load %arg4[%c2_99, %c64_100] : memref<25x128xf32, #tpu.memory_space<vmem>>, vector<3x64xf32>
    %c9_101 = arith.constant 9 : index
    %c128_102 = arith.constant 128 : index
    %64 = vector.load %arg5[%c9_101, %c128_102] : memref<18x576xf32, #tpu.memory_space<vmem>>, vector<3x64xf32>
    tpu.vector_store %arg5[%c9_101, %c128_102], %63 {strides = array<i32>} : memref<18x576xf32, #tpu.memory_space<vmem>>, vector<3x64xf32>,
    %c5_103 = arith.constant 5 : index
    %c64_104 = arith.constant 64 : index
    %65 = vector.load %arg4[%c5_103, %c64_104] : memref<25x128xf32, #tpu.memory_space<vmem>>, vector<3x64xf32>
    %c9_105 = arith.constant 9 : index
    %c192_106 = arith.constant 192 : index
    %66 = vector.load %arg5[%c9_105, %c192_106] : memref<18x576xf32, #tpu.memory_space<vmem>>, vector<3x64xf32>
    tpu.vector_store %arg5[%c9_105, %c192_106], %65 {strides = array<i32>} : memref<18x576xf32, #tpu.memory_space<vmem>>, vector<3x64xf32>,
    %c6_107 = arith.constant 6 : index
    %c64_108 = arith.constant 64 : index
    %67 = vector.load %arg4[%c6_107, %c64_108] : memref<25x128xf32, #tpu.memory_space<vmem>>, vector<3x64xf32>
    %c9_109 = arith.constant 9 : index
    %c256_110 = arith.constant 256 : index
    %68 = vector.load %arg5[%c9_109, %c256_110] : memref<18x576xf32, #tpu.memory_space<vmem>>, vector<3x64xf32>
    tpu.vector_store %arg5[%c9_109, %c256_110], %67 {strides = array<i32>} : memref<18x576xf32, #tpu.memory_space<vmem>>, vector<3x64xf32>,
    %c7_111 = arith.constant 7 : index
    %c64_112 = arith.constant 64 : index
    %69 = vector.load %arg4[%c7_111, %c64_112] : memref<25x128xf32, #tpu.memory_space<vmem>>, vector<3x64xf32>
    %c9_113 = arith.constant 9 : index
    %c320_114 = arith.constant 320 : index
    %70 = vector.load %arg5[%c9_113, %c320_114] : memref<18x576xf32, #tpu.memory_space<vmem>>, vector<3x64xf32>
    tpu.vector_store %arg5[%c9_113, %c320_114], %69 {strides = array<i32>} : memref<18x576xf32, #tpu.memory_space<vmem>>, vector<3x64xf32>,
    %c10_115 = arith.constant 10 : index
    %c64_116 = arith.constant 64 : index
    %71 = vector.load %arg4[%c10_115, %c64_116] : memref<25x128xf32, #tpu.memory_space<vmem>>, vector<3x64xf32>
    %c9_117 = arith.constant 9 : index
    %c384_118 = arith.constant 384 : index
    %72 = vector.load %arg5[%c9_117, %c384_118] : memref<18x576xf32, #tpu.memory_space<vmem>>, vector<3x64xf32>
    tpu.vector_store %arg5[%c9_117, %c384_118], %71 {strides = array<i32>} : memref<18x576xf32, #tpu.memory_space<vmem>>, vector<3x64xf32>,
    %c11_119 = arith.constant 11 : index
    %c64_120 = arith.constant 64 : index
    %73 = vector.load %arg4[%c11_119, %c64_120] : memref<25x128xf32, #tpu.memory_space<vmem>>, vector<3x64xf32>
    %c9_121 = arith.constant 9 : index
    %c448_122 = arith.constant 448 : index
    %74 = vector.load %arg5[%c9_121, %c448_122] : memref<18x576xf32, #tpu.memory_space<vmem>>, vector<3x64xf32>
    tpu.vector_store %arg5[%c9_121, %c448_122], %73 {strides = array<i32>} : memref<18x576xf32, #tpu.memory_space<vmem>>, vector<3x64xf32>,
    %c12_123 = arith.constant 12 : index
    %c64_124 = arith.constant 64 : index
    %75 = vector.load %arg4[%c12_123, %c64_124] : memref<25x128xf32, #tpu.memory_space<vmem>>, vector<3x64xf32>
    %c9_125 = arith.constant 9 : index
    %c512_126 = arith.constant 512 : index
    %76 = vector.load %arg5[%c9_125, %c512_126] : memref<18x576xf32, #tpu.memory_space<vmem>>, vector<3x64xf32>
    tpu.vector_store %arg5[%c9_125, %c512_126], %75 {strides = array<i32>} : memref<18x576xf32, #tpu.memory_space<vmem>>, vector<3x64xf32>,
    %c5_127 = arith.constant 5 : index
    %c64_128 = arith.constant 64 : index
    %77 = vector.load %arg4[%c5_127, %c64_128] : memref<25x128xf32, #tpu.memory_space<vmem>>, vector<3x64xf32>
    %c12_129 = arith.constant 12 : index
    %c0_130 = arith.constant 0 : index
    %78 = vector.load %arg5[%c12_129, %c0_130] : memref<18x576xf32, #tpu.memory_space<vmem>>, vector<3x64xf32>
    tpu.vector_store %arg5[%c12_129, %c0_130], %77 {strides = array<i32>} : memref<18x576xf32, #tpu.memory_space<vmem>>, vector<3x64xf32>,
    %c6_131 = arith.constant 6 : index
    %c64_132 = arith.constant 64 : index
    %79 = vector.load %arg4[%c6_131, %c64_132] : memref<25x128xf32, #tpu.memory_space<vmem>>, vector<3x64xf32>
    %c12_133 = arith.constant 12 : index
    %c64_134 = arith.constant 64 : index
    %80 = vector.load %arg5[%c12_133, %c64_134] : memref<18x576xf32, #tpu.memory_space<vmem>>, vector<3x64xf32>
    tpu.vector_store %arg5[%c12_133, %c64_134], %79 {strides = array<i32>} : memref<18x576xf32, #tpu.memory_space<vmem>>, vector<3x64xf32>,
    %c7_135 = arith.constant 7 : index
    %c64_136 = arith.constant 64 : index
    %81 = vector.load %arg4[%c7_135, %c64_136] : memref<25x128xf32, #tpu.memory_space<vmem>>, vector<3x64xf32>
    %c12_137 = arith.constant 12 : index
    %c128_138 = arith.constant 128 : index
    %82 = vector.load %arg5[%c12_137, %c128_138] : memref<18x576xf32, #tpu.memory_space<vmem>>, vector<3x64xf32>
    tpu.vector_store %arg5[%c12_137, %c128_138], %81 {strides = array<i32>} : memref<18x576xf32, #tpu.memory_space<vmem>>, vector<3x64xf32>,
    %c10_139 = arith.constant 10 : index
    %c64_140 = arith.constant 64 : index
    %83 = vector.load %arg4[%c10_139, %c64_140] : memref<25x128xf32, #tpu.memory_space<vmem>>, vector<3x64xf32>
    %c12_141 = arith.constant 12 : index
    %c192_142 = arith.constant 192 : index
    %84 = vector.load %arg5[%c12_141, %c192_142] : memref<18x576xf32, #tpu.memory_space<vmem>>, vector<3x64xf32>
    tpu.vector_store %arg5[%c12_141, %c192_142], %83 {strides = array<i32>} : memref<18x576xf32, #tpu.memory_space<vmem>>, vector<3x64xf32>,
    %c11_143 = arith.constant 11 : index
    %c64_144 = arith.constant 64 : index
    %85 = vector.load %arg4[%c11_143, %c64_144] : memref<25x128xf32, #tpu.memory_space<vmem>>, vector<3x64xf32>
    %c12_145 = arith.constant 12 : index
    %c256_146 = arith.constant 256 : index
    %86 = vector.load %arg5[%c12_145, %c256_146] : memref<18x576xf32, #tpu.memory_space<vmem>>, vector<3x64xf32>
    tpu.vector_store %arg5[%c12_145, %c256_146], %85 {strides = array<i32>} : memref<18x576xf32, #tpu.memory_space<vmem>>, vector<3x64xf32>,
    %c12_147 = arith.constant 12 : index
    %c64_148 = arith.constant 64 : index
    %87 = vector.load %arg4[%c12_147, %c64_148] : memref<25x128xf32, #tpu.memory_space<vmem>>, vector<3x64xf32>
    %c12_149 = arith.constant 12 : index
    %c320_150 = arith.constant 320 : index
    %88 = vector.load %arg5[%c12_149, %c320_150] : memref<18x576xf32, #tpu.memory_space<vmem>>, vector<3x64xf32>
    tpu.vector_store %arg5[%c12_149, %c320_150], %87 {strides = array<i32>} : memref<18x576xf32, #tpu.memory_space<vmem>>, vector<3x64xf32>,
    %c15_151 = arith.constant 15 : index
    %c64_152 = arith.constant 64 : index
    %89 = vector.load %arg4[%c15_151, %c64_152] : memref<25x128xf32, #tpu.memory_space<vmem>>, vector<3x64xf32>
    %c12_153 = arith.constant 12 : index
    %c384_154 = arith.constant 384 : index
    %90 = vector.load %arg5[%c12_153, %c384_154] : memref<18x576xf32, #tpu.memory_space<vmem>>, vector<3x64xf32>
    tpu.vector_store %arg5[%c12_153, %c384_154], %89 {strides = array<i32>} : memref<18x576xf32, #tpu.memory_space<vmem>>, vector<3x64xf32>,
    %c16_155 = arith.constant 16 : index
    %c64_156 = arith.constant 64 : index
    %91 = vector.load %arg4[%c16_155, %c64_156] : memref<25x128xf32, #tpu.memory_space<vmem>>, vector<3x64xf32>
    %c12_157 = arith.constant 12 : index
    %c448_158 = arith.constant 448 : index
    %92 = vector.load %arg5[%c12_157, %c448_158] : memref<18x576xf32, #tpu.memory_space<vmem>>, vector<3x64xf32>
    tpu.vector_store %arg5[%c12_157, %c448_158], %91 {strides = array<i32>} : memref<18x576xf32, #tpu.memory_space<vmem>>, vector<3x64xf32>,
    %c17_159 = arith.constant 17 : index
    %c64_160 = arith.constant 64 : index
    %93 = vector.load %arg4[%c17_159, %c64_160] : memref<25x128xf32, #tpu.memory_space<vmem>>, vector<3x64xf32>
    %c12_161 = arith.constant 12 : index
    %c512_162 = arith.constant 512 : index
    %94 = vector.load %arg5[%c12_161, %c512_162] : memref<18x576xf32, #tpu.memory_space<vmem>>, vector<3x64xf32>
    tpu.vector_store %arg5[%c12_161, %c512_162], %93 {strides = array<i32>} : memref<18x576xf32, #tpu.memory_space<vmem>>, vector<3x64xf32>,
    %c10_163 = arith.constant 10 : index
    %c64_164 = arith.constant 64 : index
    %95 = vector.load %arg4[%c10_163, %c64_164] : memref<25x128xf32, #tpu.memory_space<vmem>>, vector<3x64xf32>
    %c15_165 = arith.constant 15 : index
    %c0_166 = arith.constant 0 : index
    %96 = vector.load %arg5[%c15_165, %c0_166] : memref<18x576xf32, #tpu.memory_space<vmem>>, vector<3x64xf32>
    tpu.vector_store %arg5[%c15_165, %c0_166], %95 {strides = array<i32>} : memref<18x576xf32, #tpu.memory_space<vmem>>, vector<3x64xf32>,
    %c11_167 = arith.constant 11 : index
    %c64_168 = arith.constant 64 : index
    %97 = vector.load %arg4[%c11_167, %c64_168] : memref<25x128xf32, #tpu.memory_space<vmem>>, vector<3x64xf32>
    %c15_169 = arith.constant 15 : index
    %c64_170 = arith.constant 64 : index
    %98 = vector.load %arg5[%c15_169, %c64_170] : memref<18x576xf32, #tpu.memory_space<vmem>>, vector<3x64xf32>
    tpu.vector_store %arg5[%c15_169, %c64_170], %97 {strides = array<i32>} : memref<18x576xf32, #tpu.memory_space<vmem>>, vector<3x64xf32>,
    %c12_171 = arith.constant 12 : index
    %c64_172 = arith.constant 64 : index
    %99 = vector.load %arg4[%c12_171, %c64_172] : memref<25x128xf32, #tpu.memory_space<vmem>>, vector<3x64xf32>
    %c15_173 = arith.constant 15 : index
    %c128_174 = arith.constant 128 : index
    %100 = vector.load %arg5[%c15_173, %c128_174] : memref<18x576xf32, #tpu.memory_space<vmem>>, vector<3x64xf32>
    tpu.vector_store %arg5[%c15_173, %c128_174], %99 {strides = array<i32>} : memref<18x576xf32, #tpu.memory_space<vmem>>, vector<3x64xf32>,
    %c15_175 = arith.constant 15 : index
    %c64_176 = arith.constant 64 : index
    %101 = vector.load %arg4[%c15_175, %c64_176] : memref<25x128xf32, #tpu.memory_space<vmem>>, vector<3x64xf32>
    %c15_177 = arith.constant 15 : index
    %c192_178 = arith.constant 192 : index
    %102 = vector.load %arg5[%c15_177, %c192_178] : memref<18x576xf32, #tpu.memory_space<vmem>>, vector<3x64xf32>
    tpu.vector_store %arg5[%c15_177, %c192_178], %101 {strides = array<i32>} : memref<18x576xf32, #tpu.memory_space<vmem>>, vector<3x64xf32>,
    %c16_179 = arith.constant 16 : index
    %c64_180 = arith.constant 64 : index
    %103 = vector.load %arg4[%c16_179, %c64_180] : memref<25x128xf32, #tpu.memory_space<vmem>>, vector<3x64xf32>
    %c15_181 = arith.constant 15 : index
    %c256_182 = arith.constant 256 : index
    %104 = vector.load %arg5[%c15_181, %c256_182] : memref<18x576xf32, #tpu.memory_space<vmem>>, vector<3x64xf32>
    tpu.vector_store %arg5[%c15_181, %c256_182], %103 {strides = array<i32>} : memref<18x576xf32, #tpu.memory_space<vmem>>, vector<3x64xf32>,
    %c17_183 = arith.constant 17 : index
    %c64_184 = arith.constant 64 : index
    %105 = vector.load %arg4[%c17_183, %c64_184] : memref<25x128xf32, #tpu.memory_space<vmem>>, vector<3x64xf32>
    %c15_185 = arith.constant 15 : index
    %c320_186 = arith.constant 320 : index
    %106 = vector.load %arg5[%c15_185, %c320_186] : memref<18x576xf32, #tpu.memory_space<vmem>>, vector<3x64xf32>
    tpu.vector_store %arg5[%c15_185, %c320_186], %105 {strides = array<i32>} : memref<18x576xf32, #tpu.memory_space<vmem>>, vector<3x64xf32>,
    %c20_187 = arith.constant 20 : index
    %c64_188 = arith.constant 64 : index
    %107 = vector.load %arg4[%c20_187, %c64_188] : memref<25x128xf32, #tpu.memory_space<vmem>>, vector<3x64xf32>
    %c15_189 = arith.constant 15 : index
    %c384_190 = arith.constant 384 : index
    %108 = vector.load %arg5[%c15_189, %c384_190] : memref<18x576xf32, #tpu.memory_space<vmem>>, vector<3x64xf32>
    tpu.vector_store %arg5[%c15_189, %c384_190], %107 {strides = array<i32>} : memref<18x576xf32, #tpu.memory_space<vmem>>, vector<3x64xf32>,
    %c21_191 = arith.constant 21 : index
    %c64_192 = arith.constant 64 : index
    %109 = vector.load %arg4[%c21_191, %c64_192] : memref<25x128xf32, #tpu.memory_space<vmem>>, vector<3x64xf32>
    %c15_193 = arith.constant 15 : index
    %c448_194 = arith.constant 448 : index
    %110 = vector.load %arg5[%c15_193, %c448_194] : memref<18x576xf32, #tpu.memory_space<vmem>>, vector<3x64xf32>
    tpu.vector_store %arg5[%c15_193, %c448_194], %109 {strides = array<i32>} : memref<18x576xf32, #tpu.memory_space<vmem>>, vector<3x64xf32>,
    %c22_195 = arith.constant 22 : index
    %c64_196 = arith.constant 64 : index
    %111 = vector.load %arg4[%c22_195, %c64_196] : memref<25x128xf32, #tpu.memory_space<vmem>>, vector<3x64xf32>
    %c15_197 = arith.constant 15 : index
    %c512_198 = arith.constant 512 : index
    %112 = vector.load %arg5[%c15_197, %c512_198] : memref<18x576xf32, #tpu.memory_space<vmem>>, vector<3x64xf32>
    tpu.vector_store %arg5[%c15_197, %c512_198], %111 {strides = array<i32>} : memref<18x576xf32, #tpu.memory_space<vmem>>, vector<3x64xf32>,
    %c0_199 = arith.constant 0 : index
    %c0_200 = arith.constant 0 : index
    %113 = vector.load %arg5[%c0_199, %c0_200] : memref<18x576xf32, #tpu.memory_space<vmem>>, vector<18x576xf32>
    %c0_201 = arith.constant 0 : index
    %c0_202 = arith.constant 0 : index
    %114 = vector.load %arg1[%c0_201, %c0_202] : memref<576x64xf32, #tpu.memory_space<vmem>>, vector<576x64xf32>
    %cst = arith.constant dense<0.000000e+00> : vector<18x64xf32>
    %115 = tpu.matmul %113, %114, %cst {dimension_numbers = #tpu.dot_dimension_numbers<[1], [0], [0], [1], [0, 0, 1, 1], [], []>} : vector<18x576xf32>, vector<576x64xf32>, vector<18x64xf32> -> vector<18x64xf32>
    %cst_203 = arith.constant dense<0.000000e+00> : vector<64xf32>
    %116 = vector.multi_reduction <add>, %115, %cst_203 [0] : vector<18x64xf32> to vector<64xf32>
    %117 = vector.shape_cast %116 : vector<64xf32> to vector<1x64xf32>
    %cst_204 = arith.constant 1.800000e+01 : f32
    %118 = vector.broadcast %cst_204 : f32 to vector<1x64xf32>
    %119 = arith.divf %117, %118 : vector<1x64xf32>
    %120 = vector.broadcast %119 : vector<1x64xf32> to vector<18x64xf32>
    %121 = arith.subf %115, %120 : vector<18x64xf32>
    %122 = arith.mulf %121, %121 : vector<18x64xf32>
    %cst_205 = arith.constant dense<0.000000e+00> : vector<64xf32>
    %123 = vector.multi_reduction <add>, %122, %cst_205 [0] : vector<18x64xf32> to vector<64xf32>
    %124 = vector.shape_cast %123 : vector<64xf32> to vector<1x64xf32>
    %cst_206 = arith.constant 1.800000e+01 : f32
    %125 = vector.broadcast %cst_206 : f32 to vector<1x64xf32>
    %126 = arith.divf %124, %125 : vector<1x64xf32>
    %cst_207 = arith.constant 9.99999974E-6 : f32
    %127 = vector.broadcast %cst_207 : f32 to vector<1x64xf32>
    %128 = arith.addf %126, %127 : vector<1x64xf32>
    %129 = math.rsqrt %128 : vector<1x64xf32>
    %130 = arith.mulf %0, %129 : vector<1x64xf32>
    %131 = vector.broadcast %119 : vector<1x64xf32> to vector<18x64xf32>
    %132 = arith.subf %115, %131 : vector<18x64xf32>
    %133 = vector.broadcast %130 : vector<1x64xf32> to vector<18x64xf32>
    %134 = arith.mulf %132, %133 : vector<18x64xf32>
    %135 = vector.broadcast %1 : vector<1x64xf32> to vector<18x64xf32>
    %136 = arith.addf %134, %135 : vector<18x64xf32>
    %cst_208 = arith.constant 0.000000e+00 : f32
    %137 = vector.broadcast %cst_208 : f32 to vector<18x64xf32>
    %138 = arith.maximumf %136, %137 : vector<18x64xf32>
    %c0_209 = arith.constant 0 : index
    %c0_210 = arith.constant 0 : index
    %139 = vector.load %arg6[%c0_209, %c0_210] : memref<18x64xf32, #tpu.memory_space<vmem>>, vector<18x64xf32>
    tpu.vector_store %arg6[%c0_209, %c0_210], %138 {strides = array<i32>} : memref<18x64xf32, #tpu.memory_space<vmem>>, vector<18x64xf32>,
    %cst_211 = arith.constant 0.000000e+00 : f32
    %140 = vector.broadcast %cst_211 : f32 to vector<2x64xf32>
    %c0_212 = arith.constant 0 : index
    %c0_213 = arith.constant 0 : index
    %141 = vector.load %arg6[%c0_212, %c0_213] : memref<18x64xf32, #tpu.memory_space<vmem>>, vector<1x64xf32>
    %c9_214 = arith.constant 9 : index
    %c0_215 = arith.constant 0 : index
    %142 = vector.load %arg6[%c9_214, %c0_215] : memref<18x64xf32, #tpu.memory_space<vmem>>, vector<1x64xf32>
    %143 = tpu.concatenate %141, %142 in 0 : vector<1x64xf32>, vector<1x64xf32> -> vector<2x64xf32>
    %c0_216 = arith.constant 0 : index
    %c0_217 = arith.constant 0 : index
    %144 = vector.load %arg1[%c0_216, %c0_217] : memref<576x64xf32, #tpu.memory_space<vmem>>, vector<64x64xf32>
    %cst_218 = arith.constant dense<0.000000e+00> : vector<2x64xf32>
    %145 = tpu.matmul %143, %144, %cst_218 {dimension_numbers = #tpu.dot_dimension_numbers<[1], [0], [0], [1], [0, 0, 1, 1], [], []>} : vector<2x64xf32>, vector<64x64xf32>, vector<2x64xf32> -> vector<2x64xf32>
    %146 = arith.addf %140, %145 : vector<2x64xf32>
    %c1_219 = arith.constant 1 : index
    %c0_220 = arith.constant 0 : index
    %147 = vector.load %arg6[%c1_219, %c0_220] : memref<18x64xf32, #tpu.memory_space<vmem>>, vector<1x64xf32>
    %c10_221 = arith.constant 10 : index
    %c0_222 = arith.constant 0 : index
    %148 = vector.load %arg6[%c10_221, %c0_222] : memref<18x64xf32, #tpu.memory_space<vmem>>, vector<1x64xf32>
    %149 = tpu.concatenate %147, %148 in 0 : vector<1x64xf32>, vector<1x64xf32> -> vector<2x64xf32>
    %c64_223 = arith.constant 64 : index
    %c0_224 = arith.constant 0 : index
    %150 = vector.load %arg1[%c64_223, %c0_224] : memref<576x64xf32, #tpu.memory_space<vmem>>, vector<64x64xf32>
    %cst_225 = arith.constant dense<0.000000e+00> : vector<2x64xf32>
    %151 = tpu.matmul %149, %150, %cst_225 {dimension_numbers = #tpu.dot_dimension_numbers<[1], [0], [0], [1], [0, 0, 1, 1], [], []>} : vector<2x64xf32>, vector<64x64xf32>, vector<2x64xf32> -> vector<2x64xf32>
    %152 = arith.addf %146, %151 : vector<2x64xf32>
    %c2_226 = arith.constant 2 : index
    %c0_227 = arith.constant 0 : index
    %153 = vector.load %arg6[%c2_226, %c0_227] : memref<18x64xf32, #tpu.memory_space<vmem>>, vector<1x64xf32>
    %c11_228 = arith.constant 11 : index
    %c0_229 = arith.constant 0 : index
    %154 = vector.load %arg6[%c11_228, %c0_229] : memref<18x64xf32, #tpu.memory_space<vmem>>, vector<1x64xf32>
    %155 = tpu.concatenate %153, %154 in 0 : vector<1x64xf32>, vector<1x64xf32> -> vector<2x64xf32>
    %c128_230 = arith.constant 128 : index
    %c0_231 = arith.constant 0 : index
    %156 = vector.load %arg1[%c128_230, %c0_231] : memref<576x64xf32, #tpu.memory_space<vmem>>, vector<64x64xf32>
    %cst_232 = arith.constant dense<0.000000e+00> : vector<2x64xf32>
    %157 = tpu.matmul %155, %156, %cst_232 {dimension_numbers = #tpu.dot_dimension_numbers<[1], [0], [0], [1], [0, 0, 1, 1], [], []>} : vector<2x64xf32>, vector<64x64xf32>, vector<2x64xf32> -> vector<2x64xf32>
    %158 = arith.addf %152, %157 : vector<2x64xf32>
    %c3_233 = arith.constant 3 : index
    %c0_234 = arith.constant 0 : index
    %159 = vector.load %arg6[%c3_233, %c0_234] : memref<18x64xf32, #tpu.memory_space<vmem>>, vector<1x64xf32>
    %c12_235 = arith.constant 12 : index
    %c0_236 = arith.constant 0 : index
    %160 = vector.load %arg6[%c12_235, %c0_236] : memref<18x64xf32, #tpu.memory_space<vmem>>, vector<1x64xf32>
    %161 = tpu.concatenate %159, %160 in 0 : vector<1x64xf32>, vector<1x64xf32> -> vector<2x64xf32>
    %c192_237 = arith.constant 192 : index
    %c0_238 = arith.constant 0 : index
    %162 = vector.load %arg1[%c192_237, %c0_238] : memref<576x64xf32, #tpu.memory_space<vmem>>, vector<64x64xf32>
    %cst_239 = arith.constant dense<0.000000e+00> : vector<2x64xf32>
    %163 = tpu.matmul %161, %162, %cst_239 {dimension_numbers = #tpu.dot_dimension_numbers<[1], [0], [0], [1], [0, 0, 1, 1], [], []>} : vector<2x64xf32>, vector<64x64xf32>, vector<2x64xf32> -> vector<2x64xf32>
    %164 = arith.addf %158, %163 : vector<2x64xf32>
    %c4 = arith.constant 4 : index
    %c0_240 = arith.constant 0 : index
    %165 = vector.load %arg6[%c4, %c0_240] : memref<18x64xf32, #tpu.memory_space<vmem>>, vector<1x64xf32>
    %c13 = arith.constant 13 : index
    %c0_241 = arith.constant 0 : index
    %166 = vector.load %arg6[%c13, %c0_241] : memref<18x64xf32, #tpu.memory_space<vmem>>, vector<1x64xf32>
    %167 = tpu.concatenate %165, %166 in 0 : vector<1x64xf32>, vector<1x64xf32> -> vector<2x64xf32>
    %c256_242 = arith.constant 256 : index
    %c0_243 = arith.constant 0 : index
    %168 = vector.load %arg1[%c256_242, %c0_243] : memref<576x64xf32, #tpu.memory_space<vmem>>, vector<64x64xf32>
    %cst_244 = arith.constant dense<0.000000e+00> : vector<2x64xf32>
    %169 = tpu.matmul %167, %168, %cst_244 {dimension_numbers = #tpu.dot_dimension_numbers<[1], [0], [0], [1], [0, 0, 1, 1], [], []>} : vector<2x64xf32>, vector<64x64xf32>, vector<2x64xf32> -> vector<2x64xf32>
    %170 = arith.addf %164, %169 : vector<2x64xf32>
    %c5_245 = arith.constant 5 : index
    %c0_246 = arith.constant 0 : index
    %171 = vector.load %arg6[%c5_245, %c0_246] : memref<18x64xf32, #tpu.memory_space<vmem>>, vector<1x64xf32>
    %c14 = arith.constant 14 : index
    %c0_247 = arith.constant 0 : index
    %172 = vector.load %arg6[%c14, %c0_247] : memref<18x64xf32, #tpu.memory_space<vmem>>, vector<1x64xf32>
    %173 = tpu.concatenate %171, %172 in 0 : vector<1x64xf32>, vector<1x64xf32> -> vector<2x64xf32>
    %c320_248 = arith.constant 320 : index
    %c0_249 = arith.constant 0 : index
    %174 = vector.load %arg1[%c320_248, %c0_249] : memref<576x64xf32, #tpu.memory_space<vmem>>, vector<64x64xf32>
    %cst_250 = arith.constant dense<0.000000e+00> : vector<2x64xf32>
    %175 = tpu.matmul %173, %174, %cst_250 {dimension_numbers = #tpu.dot_dimension_numbers<[1], [0], [0], [1], [0, 0, 1, 1], [], []>} : vector<2x64xf32>, vector<64x64xf32>, vector<2x64xf32> -> vector<2x64xf32>
    %176 = arith.addf %170, %175 : vector<2x64xf32>
    %c6_251 = arith.constant 6 : index
    %c0_252 = arith.constant 0 : index
    %177 = vector.load %arg6[%c6_251, %c0_252] : memref<18x64xf32, #tpu.memory_space<vmem>>, vector<1x64xf32>
    %c15_253 = arith.constant 15 : index
    %c0_254 = arith.constant 0 : index
    %178 = vector.load %arg6[%c15_253, %c0_254] : memref<18x64xf32, #tpu.memory_space<vmem>>, vector<1x64xf32>
    %179 = tpu.concatenate %177, %178 in 0 : vector<1x64xf32>, vector<1x64xf32> -> vector<2x64xf32>
    %c384_255 = arith.constant 384 : index
    %c0_256 = arith.constant 0 : index
    %180 = vector.load %arg1[%c384_255, %c0_256] : memref<576x64xf32, #tpu.memory_space<vmem>>, vector<64x64xf32>
    %cst_257 = arith.constant dense<0.000000e+00> : vector<2x64xf32>
    %181 = tpu.matmul %179, %180, %cst_257 {dimension_numbers = #tpu.dot_dimension_numbers<[1], [0], [0], [1], [0, 0, 1, 1], [], []>} : vector<2x64xf32>, vector<64x64xf32>, vector<2x64xf32> -> vector<2x64xf32>
    %182 = arith.addf %176, %181 : vector<2x64xf32>
    %c7_258 = arith.constant 7 : index
    %c0_259 = arith.constant 0 : index
    %183 = vector.load %arg6[%c7_258, %c0_259] : memref<18x64xf32, #tpu.memory_space<vmem>>, vector<1x64xf32>
    %c16_260 = arith.constant 16 : index
    %c0_261 = arith.constant 0 : index
    %184 = vector.load %arg6[%c16_260, %c0_261] : memref<18x64xf32, #tpu.memory_space<vmem>>, vector<1x64xf32>
    %185 = tpu.concatenate %183, %184 in 0 : vector<1x64xf32>, vector<1x64xf32> -> vector<2x64xf32>
    %c448_262 = arith.constant 448 : index
    %c0_263 = arith.constant 0 : index
    %186 = vector.load %arg1[%c448_262, %c0_263] : memref<576x64xf32, #tpu.memory_space<vmem>>, vector<64x64xf32>
    %cst_264 = arith.constant dense<0.000000e+00> : vector<2x64xf32>
    %187 = tpu.matmul %185, %186, %cst_264 {dimension_numbers = #tpu.dot_dimension_numbers<[1], [0], [0], [1], [0, 0, 1, 1], [], []>} : vector<2x64xf32>, vector<64x64xf32>, vector<2x64xf32> -> vector<2x64xf32>
    %188 = arith.addf %182, %187 : vector<2x64xf32>
    %c8 = arith.constant 8 : index
    %c0_265 = arith.constant 0 : index
    %189 = vector.load %arg6[%c8, %c0_265] : memref<18x64xf32, #tpu.memory_space<vmem>>, vector<1x64xf32>
    %c17_266 = arith.constant 17 : index
    %c0_267 = arith.constant 0 : index
    %190 = vector.load %arg6[%c17_266, %c0_267] : memref<18x64xf32, #tpu.memory_space<vmem>>, vector<1x64xf32>
    %191 = tpu.concatenate %189, %190 in 0 : vector<1x64xf32>, vector<1x64xf32> -> vector<2x64xf32>
    %c512_268 = arith.constant 512 : index
    %c0_269 = arith.constant 0 : index
    %192 = vector.load %arg1[%c512_268, %c0_269] : memref<576x64xf32, #tpu.memory_space<vmem>>, vector<64x64xf32>
    %cst_270 = arith.constant dense<0.000000e+00> : vector<2x64xf32>
    %193 = tpu.matmul %191, %192, %cst_270 {dimension_numbers = #tpu.dot_dimension_numbers<[1], [0], [0], [1], [0, 0, 1, 1], [], []>} : vector<2x64xf32>, vector<64x64xf32>, vector<2x64xf32> -> vector<2x64xf32>
    %194 = arith.addf %188, %193 : vector<2x64xf32>
    %cst_271 = arith.constant dense<0.000000e+00> : vector<64xf32>
    %195 = vector.multi_reduction <add>, %194, %cst_271 [0] : vector<2x64xf32> to vector<64xf32>
    %196 = vector.shape_cast %195 : vector<64xf32> to vector<1x64xf32>
    %cst_272 = arith.constant 2.000000e+00 : f32
    %197 = vector.broadcast %cst_272 : f32 to vector<1x64xf32>
    %198 = arith.divf %196, %197 : vector<1x64xf32>
    %199 = vector.broadcast %198 : vector<1x64xf32> to vector<2x64xf32>
    %200 = arith.subf %194, %199 : vector<2x64xf32>
    %201 = arith.mulf %200, %200 : vector<2x64xf32>
    %cst_273 = arith.constant dense<0.000000e+00> : vector<64xf32>
    %202 = vector.multi_reduction <add>, %201, %cst_273 [0] : vector<2x64xf32> to vector<64xf32>
    %203 = vector.shape_cast %202 : vector<64xf32> to vector<1x64xf32>
    %cst_274 = arith.constant 2.000000e+00 : f32
    %204 = vector.broadcast %cst_274 : f32 to vector<1x64xf32>
    %205 = arith.divf %203, %204 : vector<1x64xf32>
    %cst_275 = arith.constant 9.99999974E-6 : f32
    %206 = vector.broadcast %cst_275 : f32 to vector<1x64xf32>
    %207 = arith.addf %205, %206 : vector<1x64xf32>
    %208 = math.rsqrt %207 : vector<1x64xf32>
    %209 = arith.mulf %0, %208 : vector<1x64xf32>
    %210 = vector.broadcast %198 : vector<1x64xf32> to vector<2x64xf32>
    %211 = arith.subf %194, %210 : vector<2x64xf32>
    %212 = vector.broadcast %209 : vector<1x64xf32> to vector<2x64xf32>
    %213 = arith.mulf %211, %212 : vector<2x64xf32>
    %214 = vector.broadcast %1 : vector<1x64xf32> to vector<2x64xf32>
    %215 = arith.addf %213, %214 : vector<2x64xf32>
    %216 = tpu.transpose %215, [1, 0] : vector<2x64xf32> -> vector<64x2xf32>
    %c0_276 = arith.constant 0 : index
    %c0_277 = arith.constant 0 : index
    %217 = vector.load %arg0[%c0_276, %c0_277] : memref<128x25xf32, #tpu.memory_space<vmem>>, vector<64x25xf32>
    %218 = vector.extract_strided_slice %216 {offsets = [0, 0], sizes = [64, 1], strides = [1, 1]} : vector<64x2xf32> to vector<64x1xf32>
    %219 = vector.broadcast %218 : vector<64x1xf32> to vector<64x25xf32>
    %220 = arith.addf %217, %219 : vector<64x25xf32>
    %c0_278 = arith.constant 0 : index
    %c0_279 = arith.constant 0 : index
    %221 = vector.load %arg3[%c0_278, %c0_279] : memref<128x25xf32, #tpu.memory_space<vmem>>, vector<64x25xf32>
    tpu.vector_store %arg3[%c0_278, %c0_279], %220 {strides = array<i32>} : memref<128x25xf32, #tpu.memory_space<vmem>>, vector<64x25xf32>,
    %c64_280 = arith.constant 64 : index
    %c0_281 = arith.constant 0 : index
    %222 = vector.load %arg0[%c64_280, %c0_281] : memref<128x25xf32, #tpu.memory_space<vmem>>, vector<64x25xf32>
    %223 = vector.extract_strided_slice %216 {offsets = [0, 1], sizes = [64, 1], strides = [1, 1]} : vector<64x2xf32> to vector<64x1xf32>
    %224 = vector.broadcast %223 : vector<64x1xf32> to vector<64x25xf32>
    %225 = arith.addf %222, %224 : vector<64x25xf32>
    %c64_282 = arith.constant 64 : index
    %c0_283 = arith.constant 0 : index
    %226 = vector.load %arg3[%c64_282, %c0_283] : memref<128x25xf32, #tpu.memory_space<vmem>>, vector<64x25xf32>
    tpu.vector_store %arg3[%c64_282, %c0_283], %225 {strides = array<i32>} : memref<128x25xf32, #tpu.memory_space<vmem>>, vector<64x25xf32>,
    return
  }
}

</mosaic_0001>

<bundles_post_ra>
// kernel: genblock_forward_impl.1
= control target key start
LH: loop header
LB: loop body
LE: loop exit
PB: predicated region body
PF: predicated region fallthrough
CT: control target
= control target key end

     0   :  { %s1271_s17 = smov 64   ;;  %vm69_vm0 = vcmask 518144   ;;  %vm108_vm1 = vcmask 521219   ;;  %vm163_vm2 = vcmask 523270   ;;  %vm165_vm3 = vcmask 516096   ;;  %s2043_s0 = inlined_call_operand.vmem [shape: f32[128,25], index: 0, kind: input, shape index: {}]   ;;  %s2044_s1 = inlined_call_operand.vmem [shape: f32[576,64], index: 1, kind: input, shape index: {}]   ;;  %s2045_s2 = inlined_call_operand.vmem [shape: f32[2,64], index: 2, kind: input, shape index: {}]   ;;  %s2046_s3 = inlined_call_operand.vmem [shape: f32[128,25], index: 3, kind: output, shape index: {}]  }
   0x1   :  { %v16_v0 = vld [vmem:[%s2043_s0] sm:$0xff]  ;;  %v17_v1 = vld [vmem:[%s2043_s0 + $0x8] sm:$0xff]  ;;  %v18_v2 = vld [vmem:[%s2043_s0 + $0x10] sm:$0xff]  ;;  %vm231_vm4 = vcmask 519169   ;;  %vm237_vm5 = vcmask 1043969   ;;  %vm76_vm6 = vcmask 1042944  }
   0x2   :  { %32 = vxpose.xlu0.b32.start [1/16] (narrow) %v16_v0, 32  ;;  %v19_v3 = vld [vmem:[%s2043_s0 + $0x18] sm:$0xff]  ;;  %v20_v4 = vld [vmem:[%s2043_s0 + $0x20] sm:$0xff]  ;;  %v21_v5 = vld [vmem:[%s2043_s0 + $0x28] sm:$0xff]  ;;  %vm173_vm7 = vcmask 1048070   ;;  %vm175_vm8 = vcmask 1040896  }
   0x3   :  { %v22_v6 = vld [vmem:[%s2043_s0 + $0x30] sm:$0xff]  ;;  %v23_v7 = vld [vmem:[%s2043_s0 + $0x38] sm:$0xff]  ;;  %v24_v8 = vld [vmem:[%s2043_s0 + $0x40] sm:$0xff]  ;;  %vm345_vm9 = vcmask 523271   ;;  %vm347_vm10 = vcmask 517120   ;;  %vm353_vm11 = vcmask 1048071  }
   0x4   :  { %v25_v9 = vld [vmem:[%s2043_s0 + $0x48] sm:$0xff]  ;;  %v26_v10 = vld [vmem:[%s2043_s0 + $0x50] sm:$0xff]  ;;  %v27_v11 = vld [vmem:[%s2043_s0 + $0x58] sm:$0xff]  ;;  %vm355_vm12 = vcmask 1041920   ;;  %vm288_vm13 = vcmask 522244   ;;  %vm294_vm14 = vcmask 1047044  }
   0x5   :  { %v28_v12 = vld [vmem:[%s2043_s0 + $0x60] sm:$0xff]  ;;  %v29_v13 = vld [vmem:[%s2043_s0 + $0x68] sm:$0xff]  ;;  %v30_v14 = vld [vmem:[%s2043_s0 + $0x70] sm:$0xff]  ;;  %vm116_vm15 = vcmask 1046019  }
   0x6   :  { %v31_v15 = vld [vmem:[%s2043_s0 + $0x78] sm:$0xff] }
   0xa   :  { %33 = vxpose.xlu0.b32.cont [2/16] (narrow) %v17_v1, 32 }
  0x12   :  { %34 = vxpose.xlu0.b32.cont [3/16] (narrow) %v18_v2, 32 }
  0x1a   :  { %35 = vxpose.xlu0.b32.cont [4/16] (narrow) %v19_v3, 32 }
  0x22   :  { %36 = vxpose.xlu0.b32.cont [5/16] (narrow) %v20_v4, 32 }
  0x2a   :  { %37 = vxpose.xlu0.b32.cont [6/16] (narrow) %v21_v5, 32 }
  0x32   :  { %38 = vxpose.xlu0.b32.cont [7/16] (narrow) %v22_v6, 32 }
  0x3a   :  { %39 = vxpose.xlu0.b32.cont [8/16] (narrow) %v23_v7, 32 }
  0x42   :  { %40 = vxpose.xlu0.b32.cont [9/16] (narrow) %v24_v8, 32 }
  0x4a   :  { %41 = vxpose.xlu0.b32.cont [10/16] (narrow) %v25_v9, 32 }
  0x52   :  { %42 = vxpose.xlu0.b32.cont [11/16] (narrow) %v26_v10, 32 }
  0x5a   :  { %43 = vxpose.xlu0.b32.cont [12/16] (narrow) %v27_v11, 32 }
  0x62   :  { %44 = vxpose.xlu0.b32.cont [13/16] (narrow) %v28_v12, 32 }
  0x6a   :  { %45 = vxpose.xlu0.b32.cont [14/16] (narrow) %v29_v13, 32 }
  0x72   :  { %46 = vxpose.xlu0.b32.cont [15/16] (narrow) %v30_v14, 32 }
  0x7a   :  { %47 = vxpose.xlu0.b32.end [16/16] (narrow) %v31_v15, 32 }
  0xa6   :  { %v48_v16 = vpop.trf.xlu0 }
  0xa7   :  { %64 = vst [vmem:[#allocation2] sm:$0xff] %v48_v16 }
  0xae   :  { %v49_v17 = vpop.trf.xlu0  ;;  %v71_v18 = vld [vmem:[#allocation2 + $0x1] sm:$0x7]  ;;  %v104_v23 = vld [vmem:[#allocation2 + $0x5] sm:$0x7] }
  0xaf   :  { %v225_v19 = vld [vmem:[#allocation2] sm:$0x7]  ;;  %65 = vst [vmem:[#allocation2 + $0x8] sm:$0xff] %v49_v17  ;;  %73 = vrot.lane.b32.xlu1 %v71_v18, %s1271_s17  ;;  %v106_v24 = vrot.slane %v104_v23, 5  ;;  %v80_v27 = vld [vmem:[#allocation2 + $0x5] sm:$0x7] }
  0xb0   :  { %v227_v20 = vrot.slane %v225_v19, 7  ;;  %v68_v21 = vld [vmem:[#allocation2] sm:$0x7]  ;;  %v282_v29 = vld [vmem:[#allocation2 + $0x5] sm:$0x7] }
  0xb1   :  { %v78_v22 = vld [vmem:[#allocation2 + $0x2] sm:$0x7]  ;;  %70 = vst.msk [vmem:[#allocation3] sm:$0x7] %vm69_vm0, %v68_v21  ;;  %v284_v32 = vrot.slane %v282_v29, 4 }
  0xb2   :  { %228 = vrot.lane.b32.xlu2 %v227_v20, %s1271_s17  ;;  %79 = vst.msk [vmem:[#allocation3 + $0x8] sm:$0x7] %vm69_vm0, %v78_v22  ;;  %v239_v25 = vld [vmem:[#allocation2 + $0x2] sm:$0x7] }
  0xb3   :  { %109 = vst.msk [vmem:[#allocation3] sm:$0x38] %vm108_vm1, %v106_v24  ;;  %v241_v28 = vrot.slane %v239_v25, 7  ;;  %v233_v25 = vld [vmem:[#allocation2 + $0x1] sm:$0x7] }
  0xb6   :  { %v50_v26 = vpop.trf.xlu0  ;;  %v102_v30 = vld [vmem:[#allocation2 + $0xc] sm:$0x7]  ;;  %v86_v42 = vld [vmem:[#allocation2 + $0x6] sm:$0x7] }
  0xb7   :  { %66 = vst [vmem:[#allocation2 + $0x10] sm:$0xff] %v50_v26  ;;  %82 = vrot.lane.b32.xlu1 %v80_v27, %s1271_s17  ;;  %v94_v31 = vld [vmem:[#allocation2 + $0xa] sm:$0x7]  ;;  %v118_v43 = vld [vmem:[#allocation2 + $0x7] sm:$0x7]  ;;  %v1391_v27 = vld [vmem:[%s2044_s1 + $0x78] sm:$0xff] }
  0xb8   :  { %103 = vst.msk [vmem:[#allocation3 + $0x20] sm:$0x7] %vm69_vm0, %v102_v30  ;;  %v159_v33 = vld [vmem:[#allocation2 + $0xa] sm:$0x7]  ;;  %v120_v44 = vrot.slane %v118_v43, 5  ;;  %504 = vmatpush.msra.mxu0 %v1391_v27 }
  0xb9   :  { %v96_v35 = vld [vmem:[#allocation2 + $0xb] sm:$0x7]  ;;  %95 = vst.msk [vmem:[#allocation3 + $0x18] sm:$0x7] %vm69_vm0, %v94_v31  ;;  %v161_v36 = vrot.slane %v159_v33, 2  ;;  %v1400_v33 = vld [vmem:[%s2044_s1 + $0x70] sm:$0xff] }
  0xba   :  { %242 = vrot.lane.b32.xlu2 %v241_v28, %s1271_s17  ;;  %v130_v37 = vld [vmem:[#allocation2 + $0xb] sm:$0x7]  ;;  %87 = vst.msk [vmem:[#allocation3 + $0x10] sm:$0x7] %vm69_vm0, %v86_v42  ;;  %v88_v46 = vld [vmem:[#allocation2 + $0x7] sm:$0x7]  ;;  %505 = vmatpush.msra.mxu0 %v1400_v33 }
  0xbb   :  { %v167_v39 = vld [vmem:[#allocation2 + $0xb] sm:$0x7]  ;;  %164 = vst.msk [vmem:[#allocation3] sm:$0xc0] %vm163_vm2, %v161_v36  ;;  %v132_v40 = vrot.slane %v130_v37, 5  ;;  %v235_v28 = vrot.slane %v233_v25, 7 }
  0xbc   :  { %166 = vst.msk [vmem:[#allocation3 + $0x28] sm:$0x1] %vm165_vm3, %v161_v36  ;;  %v169_v45 = vrot.slane %v167_v39, 2  ;;  %v177_v50 = vld [vmem:[#allocation2 + $0xc] sm:$0x7]  ;;  %v1412_v36 = vld [vmem:[%s2044_s1 + $0x60] sm:$0xff] }
  0xbd   :  { %134 = vst.msk [vmem:[#allocation3 + $0x10] sm:$0x38] %vm108_vm1, %v132_v40  ;;  %v179_v52 = vrot.slane %v177_v50, 2  ;;  %v110_v53 = vld [vmem:[#allocation2 + $0x6] sm:$0x7]  ;;  %v1418_v40 = vld [vmem:[%s2044_s1 + $0x58] sm:$0xff] }
  0xbe   :  { %v51_v34 = vpop.trf.xlu0  ;;  %v154_v38 = vld [vmem:[#allocation2 + $0x11] sm:$0x7]  ;;  %122 = vst.msk [vmem:[#allocation3 + $0x8] sm:$0x38] %vm108_vm1, %v120_v44  ;;  %v339_v54 = vld [vmem:[#allocation2 + $0xa] sm:$0x7] }
  0xbf   :  { %67 = vst [vmem:[#allocation2 + $0x18] sm:$0x1] %v51_v34  ;;  %285 = vrot.lane.b32.xlu1 %v284_v32, %s1271_s17  ;;  %v156_v41 = vrot.slane %v154_v38, 5  ;;  %v142_v49 = vld [vmem:[#allocation2 + $0xf] sm:$0x7]  ;;  %v112_v55 = vrot.slane %v110_v53, 5 }
  0xc0   :  { %v144_v51 = vrot.slane %v142_v49, 5  ;;  %181 = vst.msk [vmem:[#allocation3 + $0x8] sm:$0xc0] %vm163_vm2, %v179_v52  ;;  %v341_v56 = vrot.slane %v339_v54, 1  ;;  %v308_v57 = vld [vmem:[#allocation2 + $0xb] sm:$0x7] }
  0xc1   :  { %158 = vst.msk [vmem:[#allocation3 + $0x20] sm:$0x38] %vm108_vm1, %v156_v41  ;;  %v135_v58 = vld [vmem:[#allocation2 + $0xc] sm:$0x7]  ;;  %v310_v59 = vrot.slane %v308_v57, 4  ;;  %v1426_v42 = vld [vmem:[%s2044_s1 + $0x50] sm:$0xff] }
  0xc2   :  { %98 = vrot.lane.b32.xlu2 %v96_v35, %s1271_s17  ;;  %146 = vst.msk [vmem:[#allocation3 + $0x18] sm:$0x38] %vm108_vm1, %v144_v51  ;;  %v137_v60 = vrot.slane %v135_v58, 5  ;;  %v263_v61 = vld [vmem:[#allocation2 + $0xa] sm:$0x7]  ;;  %v1439_v44 = vld [vmem:[%s2044_s1 + $0x40] sm:$0xff] }
  0xc3   :  { %182 = vst.msk [vmem:[#allocation3 + $0x30] sm:$0x1] %vm165_vm3, %v179_v52  ;;  %v205_v62 = vld [vmem:[#allocation2 + $0x14] sm:$0x7]  ;;  %v191_v0 = vld [vmem:[#allocation2 + $0x10] sm:$0x7] }
  0xc4   :  { %v207_v63 = vrot.slane %v205_v62, 2  ;;  %v123_v1 = vld [vmem:[#allocation2 + $0xa] sm:$0x7]  ;;  %v193_v2 = vrot.slane %v191_v0, 2  ;;  %v265_v3 = vrot.slane %v263_v61, 7  ;;  %v1464_v50 = vld [vmem:[%s2044_s1 + $0x20] sm:$0xff] }
  0xc5   :  { %v125_v4 = vrot.slane %v123_v1, 5  ;;  %v296_v5 = vld [vmem:[#allocation2 + $0x7] sm:$0x7]  ;;  %v197_v9 = vld [vmem:[#allocation2 + $0x11] sm:$0x7]  ;;  %v1471_v52 = vld [vmem:[%s2044_s1 + $0x18] sm:$0xff] }
  0xc6   :  { %v219_v47 = vld [vmem:[#allocation2 + $0x16] sm:$0x7]  ;;  %209 = vst.msk [vmem:[#allocation3 + $0x18] sm:$0xc0] %vm163_vm2, %v207_v63  ;;  %v251_v6 = vld [vmem:[#allocation2 + $0x6] sm:$0x7] }
  0xc7   :  { %90 = vrot.lane.b32.xlu1 %v88_v46, %s1271_s17  ;;  %v221_v48 = vrot.slane %v219_v47, 2  ;;  %210 = vst.msk [vmem:[#allocation3 + $0x40] sm:$0x1] %vm165_vm3, %v207_v63  ;;  %v298_v7 = vrot.slane %v296_v5, 4  ;;  %v253_v8 = vrot.slane %v251_v6, 7  ;;  %v199_v10 = vrot.slane %v197_v9, 2 }
  0xc8   :  { %195 = vst.msk [vmem:[#allocation3 + $0x10] sm:$0xc0] %vm163_vm2, %v193_v2  ;;  %v211_v11 = vld [vmem:[#allocation2 + $0x15] sm:$0x7]  ;;  %v147_v13 = vld [vmem:[#allocation2 + $0x10] sm:$0x7] }
  0xc9   :  { %223 = vst.msk [vmem:[#allocation3 + $0x20] sm:$0xc0] %vm163_vm2, %v221_v48  ;;  %v213_v12 = vrot.slane %v211_v11, 2  ;;  %v371_v14 = vld [vmem:[#allocation2 + $0x10] sm:$0x7]  ;;  %v149_v15 = vrot.slane %v147_v13, 5 }
  0xca   :  { %170 = vrot.lane.b32.xlu2 %v169_v45, %s1271_s17  ;;  %224 = vst.msk [vmem:[#allocation3 + $0x48] sm:$0x1] %vm165_vm3, %v221_v48  ;;  %v373_v16 = vrot.slane %v371_v14, 1  ;;  %v183_v17 = vld [vmem:[#allocation2 + $0xf] sm:$0x7]  ;;  %v1445_v46 = vld [vmem:[%s2044_s1 + $0x38] sm:$0xff] }
  0xcb   :  { %196 = vst.msk [vmem:[#allocation3 + $0x38] sm:$0x1] %vm165_vm3, %v193_v2  ;;  %v320_v18 = vld [vmem:[#allocation2 + $0xf] sm:$0x7]  ;;  %v185_v19 = vrot.slane %v183_v17, 2  ;;  %v1491_v57 = vld [vmem:[%s2044_s1] sm:$0xff] }
  0xcc   :  { %v322_v20 = vrot.slane %v320_v18, 4  ;;  %v385_v21 = vld [vmem:[#allocation2 + $0x14] sm:$0x7]  ;;  %v357_v22 = vld [vmem:[#allocation2 + $0xc] sm:$0x7]  ;;  %v1520_v0 = vld [vmem:[%s2044_s1 + $0x160] sm:$0xff] }
  0xcd   :  { %v387_v23 = vrot.slane %v385_v21, 1  ;;  %v359_v24 = vrot.slane %v357_v22, 1  ;;  %v275_v26 = vld [vmem:[#allocation2 + $0xc] sm:$0x7]  ;;  %v332_v30 = vld [vmem:[#allocation2 + $0x11] sm:$0x7] }
  0xce   :  { %v277_v31 = vrot.slane %v275_v26, 7  ;;  %v334_v32 = vrot.slane %v332_v30, 4  ;;  %v1405_v34 = vld [vmem:[%s2044_s1 + $0x68] sm:$0xff]  ;;  %v246_v35 = vld [vmem:[#allocation2 + $0x5] sm:$0x7]  ;;  %v1452_v47 = vld [vmem:[%s2044_s1 + $0x30] sm:$0xff] }
  0xcf   :  { %113 = vrot.lane.b32.xlu1 %v112_v55, %s1271_s17  ;;  %v399_v37 = vld [vmem:[#allocation2 + $0x16] sm:$0x7]  ;;  %506 = vmatpush.msra.mxu0 %v1405_v34  ;;  %v248_v38 = vrot.slane %v246_v35, 7  ;;  %v1433_v43 = vld [vmem:[%s2044_s1 + $0x48] sm:$0xff]  ;;  %v1581_v14 = vld [vmem:[%s2044_s1 + $0x140] sm:$0xff]  ;;  %vm494_vm0 = vcmask 523264  }
  0xd0   :  { %v401_v41 = vrot.slane %v399_v37, 1  ;;  %v1458_v48 = vld [vmem:[%s2044_s1 + $0x28] sm:$0xff]  ;;  %v1479_v53 = vld [vmem:[%s2044_s1 + $0x10] sm:$0xff]  ;;  %v1534_v5 = vld [vmem:[%s2044_s1 + $0x1f8] sm:$0xff] }
  0xd1   :  { %507 = vmatpush.msra.mxu0 %v1412_v36  ;;  %v1485_v54 = vld [vmem:[%s2044_s1 + $0x8] sm:$0xff]  ;;  %v1507_v61 = vld [vmem:[%s2044_s1 + $0x170] sm:$0xff]  ;;  %v1539_v6 = vld [vmem:[%s2044_s1 + $0x238] sm:$0xff]  ;;  %582 = vmatpush.msra.mxu3 %v1534_v5 }
  0xd2   :  { %342 = vrot.lane.b32.xlu2 %v341_v56, %s1271_s17  ;;  %v349_v56 = vld [vmem:[#allocation2 + $0xb] sm:$0x7]  ;;  %v290_v63 = vld [vmem:[#allocation2 + $0x6] sm:$0x7]  ;;  %v1558_v9 = vld [vmem:[%s2044_s1 + $0x230] sm:$0xff] }
  0xd3   :  { %508 = vmatpush.msra.mxu0 %v1418_v40  ;;  %v1512_v62 = vld [vmem:[%s2044_s1 + $0x168] sm:$0xff]  ;;  %v292_v2 = vrot.slane %v290_v63, 4  ;;  %v1600_v18 = vld [vmem:[%s2044_s1 + $0xf8] sm:$0xff]  ;;  %v1625_v22 = vld [vmem:[%s2044_s1 + $0xf0] sm:$0xff] }
  0xd4   :  { %v1570_v11 = vld [vmem:[%s2044_s1 + $0x1e8] sm:$0xff]  ;;  %v1618_v21 = vld [vmem:[%s2044_s1 + $0x218] sm:$0xff]  ;;  %530 = vmatpush.msra.mxu1 %v1600_v18  ;;  %v1642_v25 = vld [vmem:[%s2044_s1 + $0x210] sm:$0xff] }
  0xd5   :  { %509 = vmatpush.msra.mxu0 %v1426_v42  ;;  %2054 = vst [vmem:[#allocation5_spill] sm:$0xff] %v1618_v21  ;;  %v1647_v26 = vld [vmem:[%s2044_s1 + $0xe8] sm:$0xff]  ;;  %v1678_v37 = vld [vmem:[%s2044_s1 + $0x120] sm:$0xff]  ;;  %v476_v63 = vld [vmem:[%s2044_s1 + $0x1b0] sm:$0xff] }
  0xd6   :  { %2056 = vst [vmem:[#allocation7_spill] sm:$0xff] %v1642_v25  ;;  %531 = vmatpush.msra.mxu1 %v1625_v22  ;;  %v258_v30 = vld [vmem:[#allocation2 + $0x7] sm:$0x7] }
  0xd7   :  { %311 = vrot.lane.b32.xlu1 %v310_v59, %s1271_s17  ;;  %510 = vmatpush.msra.mxu0 %v1433_v43  ;;  %v1498_v59 = vld [vmem:[%s2044_s1 + $0x178] sm:$0xff] }
  0xd8   :  { %556 = vmatpush.msra.mxu2 %v1498_v59  ;;  %532 = vmatpush.msra.mxu1 %v1647_v26 }
  0xd9   :  { %511 = vmatpush.msra.mxu0 %v1439_v44 }
  0xda   :  { %138 = vrot.lane.b32.xlu2 %v137_v60, %s1271_s17  ;;  %v351_v60 = vrot.slane %v349_v56, 1  ;;  %557 = vmatpush.msra.mxu2 %v1507_v61  ;;  %v315_v56 = vld [vmem:[#allocation2 + $0xc] sm:$0x7] }
  0xdb   :  { %512 = vmatpush.msra.mxu0 %v1445_v46 }
  0xdc   :  { %558 = vmatpush.msra.mxu2 %v1512_v62 }
  0xdd   :  { %513 = vmatpush.msra.mxu0 %v1452_v47 }
  0xde   :  { %559 = vmatpush.msra.mxu2 %v1520_v0 }
  0xdf   :  { %266 = vrot.lane.b32.xlu1 %v265_v3, %s1271_s17  ;;  %514 = vmatpush.msra.mxu0 %v1458_v48 }
  0xe1   :  { %515 = vmatpush.msra.mxu0 %v1464_v50 }
  0xe2   :  { %126 = vrot.lane.b32.xlu2 %v125_v4, %s1271_s17  ;;  %v1529_v4 = vld [vmem:[%s2044_s1 + $0x158] sm:$0xff] }
  0xe3   :  { %516 = vmatpush.msra.mxu0 %v1471_v52  ;;  %560 = vmatpush.msra.mxu2 %v1529_v4 }
  0xe5   :  { %517 = vmatpush.msra.mxu0 %v1479_v53 }
  0xe7   :  { %299 = vrot.lane.b32.xlu1 %v298_v7, %s1271_s17  ;;  %518 = vmatpush.msra.mxu0 %v1485_v54  ;;  %v1548_v7 = vld [vmem:[%s2044_s1 + $0x150] sm:$0xff] }
  0xe8   :  { %561 = vmatpush.msra.mxu2 %v1548_v7 }
  0xe9   :  { %519 = vmatpush.msra.mxu0 %v1491_v57 }
  0xea   :  { %254 = vrot.lane.b32.xlu2 %v253_v8, %s1271_s17  ;;  %v1553_v8 = vld [vmem:[%s2044_s1 + $0x1f0] sm:$0xff] }
  0xeb   :  { %616 = vmatpush.msrb.mxu0 %v1539_v6  ;;  %583 = vmatpush.msra.mxu3 %v1553_v8 }
  0xed   :  { %617 = vmatpush.msrb.mxu0 %v1558_v9  ;;  %584 = vmatpush.msra.mxu3 %v1570_v11 }
  0xef   :  { %200 = vrot.lane.b32.xlu1 %v199_v10, %s1271_s17  ;;  %v1565_v10 = vld [vmem:[%s2044_s1 + $0x148] sm:$0xff] }
  0xf0   :  { %562 = vmatpush.msra.mxu2 %v1565_v10 }
  0xf2   :  { %214 = vrot.lane.b32.xlu2 %v213_v12, %s1271_s17  ;;  %v1575_v12 = vld [vmem:[%s2044_s1 + $0x228] sm:$0xff]  ;;  %563 = vmatpush.msra.mxu2 %v1581_v14 }
  0xf3   :  { %618 = vmatpush.msrb.mxu0 %v1575_v12 }
  0xf7   :  { %150 = vrot.lane.b32.xlu1 %v149_v15, %s1271_s17  ;;  %v1586_v15 = vld [vmem:[%s2044_s1 + $0x1e0] sm:$0xff] }
  0xf8   :  { %585 = vmatpush.msra.mxu3 %v1586_v15 }
  0xfa   :  { %374 = vrot.lane.b32.xlu2 %v373_v16, %s1271_s17  ;;  %v1594_v16 = vld [vmem:[%s2044_s1 + $0x220] sm:$0xff] }
  0xfb   :  { %619 = vmatpush.msrb.mxu0 %v1594_v16 }
  0xfd   :  { %620 = vmatpush.msrb.mxu0 %v1618_v21 }
  0xff   :  { %186 = vrot.lane.b32.xlu1 %v185_v19, %s1271_s17  ;;  %v1605_v19 = vld [vmem:[%s2044_s1 + $0x138] sm:$0xff]  ;;  %621 = vmatpush.msrb.mxu0 %v1642_v25 }
 0x100   :  { %564 = vmatpush.msra.mxu2 %v1605_v19 }
 0x102   :  { %323 = vrot.lane.b32.xlu2 %v322_v20, %s1271_s17  ;;  %v1610_v20 = vld [vmem:[%s2044_s1 + $0x1d8] sm:$0xff] }
 0x103   :  { %586 = vmatpush.msra.mxu3 %v1610_v20 }
 0x107   :  { %388 = vrot.lane.b32.xlu1 %v387_v23, %s1271_s17  ;;  %v1630_v23 = vld [vmem:[%s2044_s1 + $0x130] sm:$0xff] }
 0x108   :  { %565 = vmatpush.msra.mxu2 %v1630_v23 }
 0x10a   :  { %360 = vrot.lane.b32.xlu2 %v359_v24, %s1271_s17  ;;  %v1635_v24 = vld [vmem:[%s2044_s1 + $0x1d0] sm:$0xff] }
 0x10b   :  { %2055 = vst [vmem:[#allocation6_spill] sm:$0xff] %v1635_v24  ;;  %587 = vmatpush.msra.mxu3 %v1635_v24  ;;  %v379_v24 = vld [vmem:[#allocation2 + $0x11] sm:$0x7] }
 0x10c   :  { %v229_v29 = vpop.permute.xlu2 %228  ;;  %v381_v21 = vrot.slane %v379_v24, 1  ;;  %v327_v24 = vld [vmem:[#allocation2 + $0x10] sm:$0x7] }
 0x10d   :  { %232 = vst.msk [vmem:[#allocation3 + $0x28] sm:$0xe] %vm231_vm4, %v229_v29  ;;  %v1659_v29 = vld [vmem:[%s2044_s1 + $0x1c8] sm:$0xff] }
 0x10e   :  { %238 = vst.msk [vmem:[#allocation3 + $0x28] sm:$0xe] %vm237_vm5, %v235_v28  ;;  %v1654_v28 = vld [vmem:[%s2044_s1 + $0x128] sm:$0xff]  ;;  %588 = vmatpush.msra.mxu3 %v1659_v29 }
 0x10f   :  { %278 = vrot.lane.b32.xlu1 %v277_v31, %s1271_s17  ;;  %2057 = vst [vmem:[#allocation8_spill] sm:$0xff] %v1659_v29  ;;  %v1666_v31 = vld [vmem:[%s2044_s1 + $0x208] sm:$0xff]  ;;  %566 = vmatpush.msra.mxu2 %v1654_v28 }
 0x110   :  { %2058 = vst [vmem:[#allocation9_spill] sm:$0xff] %v1666_v31  ;;  %622 = vmatpush.msrb.mxu0 %v1666_v31 }
 0x111   :  { %567 = vmatpush.msra.mxu2 %v1678_v37 }
 0x112   :  { %335 = vrot.lane.b32.xlu2 %v334_v32, %s1271_s17  ;;  %v1671_v32 = vld [vmem:[%s2044_s1 + $0xe0] sm:$0xff] }
 0x113   :  { %533 = vmatpush.msra.mxu1 %v1671_v32 }
 0x114   :  { %v243_v39 = vpop.permute.xlu2 %242 }
 0x115   :  { %245 = vst.msk [vmem:[#allocation3 + $0x30] sm:$0xe] %vm231_vm4, %v243_v39  ;;  %v1691_v39 = vld [vmem:[%s2044_s1 + $0x200] sm:$0xff] }
 0x116   :  { %250 = vst.msk [vmem:[#allocation3 + $0x30] sm:$0xe] %vm237_vm5, %v248_v38  ;;  %v1683_v38 = vld [vmem:[%s2044_s1 + $0x1c0] sm:$0xff]  ;;  %623 = vmatpush.msrb.mxu0 %v1691_v39 }
 0x117   :  { %402 = vrot.lane.b32.xlu1 %v401_v41, %s1271_s17  ;;  %2059 = vst [vmem:[#allocation10_spill] sm:$0xff] %v1683_v38  ;;  %v260_v41 = vrot.slane %v258_v30, 7  ;;  %589 = vmatpush.msra.mxu3 %v1683_v38  ;;  %v472_v38 = vld [vmem:[%s2044_s1 + $0x190] sm:$0xff] }
 0x118   :  { %2060 = vst [vmem:[#allocation11_spill] sm:$0xff] %v1691_v39  ;;  %v270_v39 = vld [vmem:[#allocation2 + $0xb] sm:$0x7] }
 0x119   :  { %v272_v31 = vrot.slane %v270_v39, 7  ;;  %v441_v39 = vld [vmem:[%s2044_s1 + $0x98] sm:$0xff] }
 0x11c   :  { %v99_v45 = vpop.permute.xlu2 %98 }
 0x11d   :  { %101 = vst.msk [vmem:[#allocation3 + $0x18] sm:$0x7] %vm76_vm6, %v99_v45 }
 0x121   :  { %v74_v49 = vpop.permute.xlu1 %73 }
 0x122   :  { %77 = vst.msk [vmem:[#allocation3] sm:$0x7] %vm76_vm6, %v74_v49  ;;  %v1698_v49 = vld [vmem:[%s2044_s1 + $0xd8] sm:$0xff] }
 0x123   :  { %534 = vmatpush.msra.mxu1 %v1698_v49 }
 0x124   :  { %v171_v51 = vpop.permute.xlu2 %170 }
 0x125   :  { %174 = vst.msk [vmem:[#allocation3] sm:$0xc0] %vm173_vm7, %v171_v51 }
 0x126   :  { %176 = vst.msk [vmem:[#allocation3 + $0x28] sm:$0x1] %vm175_vm8, %v171_v51  ;;  %v1703_v51 = vld [vmem:[%s2044_s1 + $0x118] sm:$0xff] }
 0x127   :  { %568 = vmatpush.msra.mxu2 %v1703_v51 }
 0x129   :  { %v83_v55 = vpop.permute.xlu1 %82 }
 0x12a   :  { %85 = vst.msk [vmem:[#allocation3 + $0x8] sm:$0x7] %vm76_vm6, %v83_v55  ;;  %v477_v55 = vld [vmem:[%s2044_s1 + $0x1b8] sm:$0xff] }
 0x12b   :  { %590 = vmatpush.msra.mxu3 %v477_v55 }
 0x12c   :  { %v343_v58 = vpop.permute.xlu2 %342 }
 0x12d   :  { %346 = vst.msk [vmem:[#allocation3 + $0x28] sm:$0x80] %vm345_vm9, %v343_v58  ;;  %591 = vmatpush.msra.mxu3 %v476_v63 }
 0x12e   :  { %348 = vst.msk [vmem:[#allocation3 + $0x50] sm:$0x3] %vm347_vm10, %v343_v58  ;;  %v1718_v58 = vld [vmem:[%s2044_s1 + $0xd0] sm:$0xff] }
 0x12f   :  { %354 = vst.msk [vmem:[#allocation3 + $0x28] sm:$0x80] %vm353_vm11, %v351_v60  ;;  %535 = vmatpush.msra.mxu1 %v1718_v58 }
 0x130   :  { %356 = vst.msk [vmem:[#allocation3 + $0x50] sm:$0x3] %vm355_vm12, %v351_v60  ;;  %v1723_v60 = vld [vmem:[%s2044_s1 + $0x110] sm:$0xff] }
 0x131   :  { %v286_v1 = vpop.permute.xlu1 %285  ;;  %569 = vmatpush.msra.mxu2 %v1723_v60 }
 0x132   :  { %289 = vst.msk [vmem:[#allocation3 + $0x28] sm:$0x70] %vm288_vm13, %v286_v1  ;;  %v1733_v1 = vld [vmem:[%s2044_s1 + $0xc8] sm:$0xff] }
 0x133   :  { %295 = vst.msk [vmem:[#allocation3 + $0x28] sm:$0x70] %vm294_vm14, %v292_v2  ;;  %v1738_v2 = vld [vmem:[%s2044_s1 + $0x108] sm:$0xff]  ;;  %536 = vmatpush.msra.mxu1 %v1733_v1 }
 0x134   :  { %v139_v3 = vpop.permute.xlu2 %138  ;;  %570 = vmatpush.msra.mxu2 %v1738_v2 }
 0x135   :  { %141 = vst.msk [vmem:[#allocation3 + $0x10] sm:$0x38] %vm116_vm15, %v139_v3  ;;  %v475_v3 = vld [vmem:[%s2044_s1 + $0x1a8] sm:$0xff] }
 0x136   :  { %592 = vmatpush.msra.mxu3 %v475_v3 }
 0x139   :  { %v91_v13 = vpop.permute.xlu1 %90 }
 0x13a   :  { %93 = vst.msk [vmem:[#allocation3 + $0x10] sm:$0x7] %vm76_vm6, %v91_v13  ;;  %v317_v13 = vrot.slane %v315_v56, 4  ;;  %v412_v25 = vld [vmem:[#allocation3 + $0x28] sm:$0xff] }
 0x13c   :  { %v127_v17 = vpop.permute.xlu2 %126 }
 0x13d   :  { %129 = vst.msk [vmem:[#allocation3 + $0x8] sm:$0x38] %vm116_vm15, %v127_v17 }
 0x141   :  { %v114_v35 = vpop.permute.xlu1 %113 }
 0x142   :  { %117 = vst.msk [vmem:[#allocation3] sm:$0x38] %vm116_vm15, %v114_v35  ;;  %v1746_v35 = vld [vmem:[%s2044_s1 + $0xc0] sm:$0xff] }
 0x143   :  { %537 = vmatpush.msra.mxu1 %v1746_v35 }
 0x144   :  { %v255_v45 = vpop.permute.xlu2 %254 }
 0x145   :  { %257 = vst.msk [vmem:[#allocation3 + $0x38] sm:$0xe] %vm231_vm4, %v255_v45  ;;  %v474_v45 = vld [vmem:[%s2044_s1 + $0x1a0] sm:$0xff] }
 0x146   :  { %262 = vst.msk [vmem:[#allocation3 + $0x38] sm:$0xe] %vm237_vm5, %v260_v41  ;;  %v1753_v41 = vld [vmem:[%s2044_s1 + $0x100] sm:$0xff]  ;;  %593 = vmatpush.msra.mxu3 %v474_v45 }
 0x147   :  { %571 = vmatpush.msra.mxu2 %v1753_v41 }
 0x149   :  { %v312_v17 = vpop.permute.xlu1 %311  ;;  %v407_v30 = vld [vmem:[#allocation3] sm:$0xff]  ;;  %760 = vmatpush.msrb.mxu2 %v1445_v46 }
 0x14a   :  { %314 = vst.msk [vmem:[#allocation3 + $0x38] sm:$0x70] %vm288_vm13, %v312_v17  ;;  %520 = vmatmul.f32.vlgmr.msra.gmra.mxu0 %v407_v30  ;;  %v445_v17 = vld [vmem:[%s2044_s1 + $0xb8] sm:$0xff]  ;;  %v442_v46 = vld [vmem:[%s2044_s1 + $0xa0] sm:$0xff] }
 0x14b   :  { %319 = vst.msk [vmem:[#allocation3 + $0x38] sm:$0x70] %vm294_vm14, %v317_v13  ;;  %v473_v30 = vld [vmem:[%s2044_s1 + $0x198] sm:$0xff]  ;;  %949 = vmatpush.msra.mxu0 %v477_v55  ;;  %v444_v13 = vld [vmem:[%s2044_s1 + $0xb0] sm:$0xff]  ;;  %538 = vmatpush.msra.mxu1 %v445_v17  ;;  %v443_v55 = vld [vmem:[%s2044_s1 + $0xa8] sm:$0xff] }
 0x14c   :  { %v215_v56 = vpop.permute.xlu2 %214  ;;  %594 = vmatpush.msra.mxu3 %v473_v30  ;;  %761 = vmatpush.msrb.mxu2 %v1452_v47 }
 0x14d   :  { %217 = vst.msk [vmem:[#allocation3 + $0x18] sm:$0xc0] %vm173_vm7, %v215_v56  ;;  %950 = vmatpush.msra.mxu0 %v476_v63  ;;  %539 = vmatpush.msra.mxu1 %v444_v13  ;;  %v470_v63 = vld [vmem:[%s2044_s1 + $0x180] sm:$0xff] }
 0x14e   :  { %218 = vst.msk [vmem:[#allocation3 + $0x40] sm:$0x1] %vm175_vm8, %v215_v56  ;;  %v471_v56 = vld [vmem:[%s2044_s1 + $0x188] sm:$0xff]  ;;  %595 = vmatpush.msra.mxu3 %v472_v38  ;;  %762 = vmatpush.msrb.mxu2 %v1458_v48 }
 0x14f   :  { %951 = vmatpush.msra.mxu0 %v475_v3  ;;  %540 = vmatpush.msra.mxu1 %v443_v55  ;;  %v439_v48 = vld [vmem:[%s2044_s1 + $0x88] sm:$0xff] }
 0x150   :  { %596 = vmatpush.msra.mxu3 %v471_v56  ;;  %763 = vmatpush.msrb.mxu2 %v1464_v50  ;;  %v417_v50 = vld [vmem:[#allocation3 + $0x50] sm:$0x3] }
 0x151   :  { %v267_v29 = vpop.permute.xlu1 %266  ;;  %541 = vmatpush.msra.mxu1 %v442_v46  ;;  %952 = vmatpush.msra.mxu0 %v474_v45  ;;  %v438_v45 = vld [vmem:[%s2044_s1 + $0x80] sm:$0xff] }
 0x152   :  { %269 = vst.msk [vmem:[#allocation3 + $0x40] sm:$0xe] %vm231_vm4, %v267_v29  ;;  %523 = vmatmul.f32.gmra.mxu0 %v412_v25  ;;  %597 = vmatpush.msra.mxu3 %v470_v63  ;;  %v440_v25 = vld [vmem:[%s2044_s1 + $0x90] sm:$0xff]  ;;  %v303_v29 = vld [vmem:[#allocation2 + $0xa] sm:$0x7] }
 0x153   :  { %274 = vst.msk [vmem:[#allocation3 + $0x40] sm:$0xe] %vm237_vm5, %v272_v31  ;;  %542 = vmatpush.msra.mxu1 %v441_v39  ;;  %764 = vmatpush.msrb.mxu2 %v1471_v52  ;;  %v305_v31 = vrot.slane %v303_v29, 4  ;;  %v329_v52 = vrot.slane %v327_v24, 4  ;;  %vm702_vm5 = vcmask 1040384  }
 0x154   :  { %v375_v47 = vpop.permute.xlu2 %374  ;;  %797 = vmatpush.msrb.mxu3 %v445_v17  ;;  %953 = vmatpush.msra.mxu0 %v473_v30  ;;  %v365_v17 = vld [vmem:[#allocation2 + $0xf] sm:$0x7] }
 0x155   :  { %377 = vst.msk [vmem:[#allocation3 + $0x38] sm:$0x80] %vm345_vm9, %v375_v47  ;;  %543 = vmatpush.msra.mxu1 %v440_v25  ;;  %765 = vmatpush.msrb.mxu2 %v1479_v53 }
 0x156   :  { %378 = vst.msk [vmem:[#allocation3 + $0x60] sm:$0x3] %vm347_vm10, %v375_v47  ;;  %798 = vmatpush.msrb.mxu3 %v444_v13  ;;  %954 = vmatpush.msra.mxu0 %v472_v38  ;;  %v411_v38 = vld [vmem:[#allocation3 + $0x20] sm:$0xff]  ;;  %v1272_v13 = vmov 18.0  }
 0x157   :  { %383 = vst.msk [vmem:[#allocation3 + $0x38] sm:$0x80] %vm353_vm11, %v381_v21  ;;  %544 = vmatpush.msra.mxu1 %v439_v48  ;;  %766 = vmatpush.msrb.mxu2 %v1485_v54  ;;  %v367_v54 = vrot.slane %v365_v17, 1  ;;  %1263 = vrcp.f32 %v1272_v13 }
 0x158   :  { %384 = vst.msk [vmem:[#allocation3 + $0x60] sm:$0x3] %vm355_vm12, %v381_v21  ;;  %799 = vmatpush.msrb.mxu3 %v443_v55  ;;  %955 = vmatpush.msra.mxu0 %v471_v56 }
 0x159   :  { %v300_v3 = vpop.permute.xlu1 %299  ;;  %545 = vmatpush.msra.mxu1 %v438_v45  ;;  %767 = vmatpush.msrb.mxu2 %v1491_v57 }
 0x15a   :  { %302 = vst.msk [vmem:[#allocation3 + $0x30] sm:$0x70] %vm288_vm13, %v300_v3  ;;  %526 = vmatmul.f32.gmra.mxu0 %v417_v50  ;;  %800 = vmatpush.msrb.mxu3 %v442_v46 }
 0x15b   :  { %307 = vst.msk [vmem:[#allocation3 + $0x30] sm:$0x70] %vm294_vm14, %v305_v31  ;;  %737 = vmatpush.msrb.mxu1 %v1391_v27  ;;  %956 = vmatpush.msra.mxu0 %v470_v63 }
 0x15c   :  { %v324_v21 = vpop.permute.xlu2 %323  ;;  %801 = vmatpush.msrb.mxu3 %v441_v39 }
 0x15d   :  { %326 = vst.msk [vmem:[#allocation3 + $0x40] sm:$0x70] %vm288_vm13, %v324_v21  ;;  %738 = vmatpush.msrb.mxu1 %v1400_v33 }
 0x15e   :  { %331 = vst.msk [vmem:[#allocation3 + $0x40] sm:$0x70] %vm294_vm14, %v329_v52  ;;  %802 = vmatpush.msrb.mxu3 %v440_v25  ;;  %v1264_v25 = vpop.eup %1263 }
 0x15f   :  { %739 = vmatpush.msrb.mxu1 %v1405_v34  ;;  %vm650_vm1 = vweird.f32 %v1264_v25 }
 0x160   :  { %803 = vmatpush.msrb.mxu3 %v439_v48 }
 0x161   :  { %v201_v53 = vpop.permute.xlu1 %200  ;;  %740 = vmatpush.msrb.mxu1 %v1412_v36 }
 0x162   :  { %203 = vst.msk [vmem:[#allocation3 + $0x10] sm:$0xc0] %vm173_vm7, %v201_v53  ;;  %1235 = vmatmul.msk.f32.vlgmr.msrb.gmra.mxu0 %vm494_vm0, %v411_v38  ;;  %804 = vmatpush.msrb.mxu3 %v438_v45  ;;  %v646_v45 = vmul.f32 18.0, %v1264_v25 }
 0x163   :  { %204 = vst.msk [vmem:[#allocation3 + $0x38] sm:$0x1] %vm175_vm8, %v201_v53  ;;  %741 = vmatpush.msrb.mxu1 %v1418_v40 }
 0x164   :  { %v361_v27 = vpop.permute.xlu2 %360 }
 0x165   :  { %363 = vst.msk [vmem:[#allocation3 + $0x30] sm:$0x80] %vm345_vm9, %v361_v27  ;;  %742 = vmatpush.msrb.mxu1 %v1426_v42 }
 0x166   :  { %364 = vst.msk [vmem:[#allocation3 + $0x58] sm:$0x3] %vm347_vm10, %v361_v27  ;;  %v647_v27 = vsub.f32 1.0, %v646_v45 }
 0x167   :  { %369 = vst.msk [vmem:[#allocation3 + $0x30] sm:$0x80] %vm353_vm11, %v367_v54  ;;  %743 = vmatpush.msrb.mxu1 %v1433_v43  ;;  %v393_v43 = vld [vmem:[#allocation2 + $0x15] sm:$0x7] }
 0x168   :  { %370 = vst.msk [vmem:[#allocation3 + $0x58] sm:$0x3] %vm355_vm12, %v367_v54 }
 0x169   :  { %v151_v33 = vpop.permute.xlu1 %150  ;;  %v409_v34 = vld [vmem:[#allocation3 + $0x10] sm:$0xff]  ;;  %744 = vmatpush.msrb.mxu1 %v1439_v44 }
 0x16a   :  { %153 = vst.msk [vmem:[#allocation3 + $0x18] sm:$0x38] %vm116_vm15, %v151_v33  ;;  %572 = vmatmul.f32.vlgmr.msra.gmra.mxu2 %v409_v34  ;;  %v414_v42 = vld [vmem:[#allocation3 + $0x38] sm:$0xff]  ;;  %v648_v34 = vmul.f32 %v1264_v25, %v647_v27 }
 0x16b   :  { %873 = vmatpush.msra.mxu2 %v1605_v19 }
 0x16c   :  { %v336_v36 = vpop.permute.xlu2 %335 }
 0x16d   :  { %338 = vst.msk [vmem:[#allocation3 + $0x48] sm:$0x70] %vm288_vm13, %v336_v36  ;;  %874 = vmatpush.msra.mxu2 %v1630_v23  ;;  %v419_v23 = vld [vmem:[#allocation3 + $0x60] sm:$0x3] }
 0x16f   :  { %875 = vmatpush.msra.mxu2 %v1654_v28  ;;  %v395_v28 = vrot.slane %v393_v43, 1 }
 0x171   :  { %v187_v40 = vpop.permute.xlu1 %186  ;;  %v410_v57 = vld [vmem:[#allocation3 + $0x18] sm:$0xff]  ;;  %876 = vmatpush.msra.mxu2 %v1678_v37 }
 0x172   :  { %189 = vst.msk [vmem:[#allocation3 + $0x8] sm:$0xc0] %vm173_vm7, %v187_v40  ;;  %575 = vmatmul.f32.gmra.mxu2 %v414_v42  ;;  %598 = vmatmul.f32.vlgmr.msra.gmra.mxu3 %v410_v57  ;;  %v649_v42 = vadd.f32 %v1264_v25, %v648_v34 }
 0x173   :  { %190 = vst.msk [vmem:[#allocation3 + $0x30] sm:$0x1] %vm175_vm8, %v187_v40  ;;  %911 = vmatpush.msra.mxu3 %v1498_v59  ;;  %877 = vmatpush.msra.mxu2 %v1703_v51 }
 0x175   :  { %912 = vmatpush.msra.mxu3 %v1507_v61  ;;  %878 = vmatpush.msra.mxu2 %v1723_v60 }
 0x177   :  { %913 = vmatpush.msra.mxu3 %v1512_v62  ;;  %879 = vmatpush.msra.mxu2 %v1738_v2 }
 0x179   :  { %v389_v44 = vpop.permute.xlu1 %388  ;;  %v408_v19 = vld [vmem:[#allocation3 + $0x8] sm:$0xff]  ;;  %914 = vmatpush.msra.mxu3 %v1520_v0  ;;  %880 = vmatpush.msra.mxu2 %v1753_v41 }
 0x17a   :  { %391 = vst.msk [vmem:[#allocation3 + $0x40] sm:$0x80] %vm345_vm9, %v389_v44  ;;  %546 = vmatmul.f32.vlgmr.msra.gmra.mxu1 %v408_v19  ;;  %578 = vmatmul.f32.gmra.mxu2 %v419_v23  ;;  %v413_v61 = vld [vmem:[#allocation3 + $0x30] sm:$0xff] }
 0x17b   :  { %392 = vst.msk [vmem:[#allocation3 + $0x68] sm:$0x3] %vm347_vm10, %v389_v44  ;;  %835 = vmatpush.msra.mxu1 %v1600_v18  ;;  %915 = vmatpush.msra.mxu3 %v1529_v4  ;;  %v418_v4 = vld [vmem:[#allocation3 + $0x58] sm:$0x3]  ;;  %v651_v44 = vsel %vm650_vm1, %v1264_v25, %v649_v42 }
 0x17c   :  { %397 = vst.msk [vmem:[#allocation3 + $0x40] sm:$0x80] %vm353_vm11, %v395_v28 }
 0x17d   :  { %398 = vst.msk [vmem:[#allocation3 + $0x68] sm:$0x3] %vm355_vm12, %v395_v28  ;;  %836 = vmatpush.msra.mxu1 %v1625_v22  ;;  %916 = vmatpush.msra.mxu3 %v1548_v7 }
 0x17f   :  { %837 = vmatpush.msra.mxu1 %v1647_v26  ;;  %917 = vmatpush.msra.mxu3 %v1565_v10 }
 0x181   :  { %v279_v59 = vpop.permute.xlu1 %278  ;;  %838 = vmatpush.msra.mxu1 %v1671_v32  ;;  %918 = vmatpush.msra.mxu3 %v1581_v14 }
 0x182   :  { %281 = vst.msk [vmem:[#allocation3 + $0x48] sm:$0xe] %vm231_vm4, %v279_v59  ;;  %549 = vmatmul.f32.gmra.mxu1 %v413_v61 }
 0x183   :  { %v415_v62 = vld [vmem:[#allocation3 + $0x40] sm:$0xff]  ;;  %839 = vmatpush.msra.mxu1 %v1698_v49 }
 0x184   :  { %601 = vmatmul.f32.gmra.mxu3 %v415_v62  ;;  %v420_v7 = vld [vmem:[#allocation3 + $0x68] sm:$0x3] }
 0x185   :  { %840 = vmatpush.msra.mxu1 %v1718_v58 }
 0x187   :  { %841 = vmatpush.msra.mxu1 %v1733_v1 }
 0x189   :  { %v403_v0 = vpop.permute.xlu1 %402  ;;  %842 = vmatpush.msra.mxu1 %v1746_v35 }
 0x18a   :  { %405 = vst.msk [vmem:[#allocation3 + $0x48] sm:$0x80] %vm345_vm9, %v403_v0  ;;  %552 = vmatmul.f32.gmra.mxu1 %v418_v4 }
 0x18b   :  { %406 = vst.msk [vmem:[#allocation3 + $0x70] sm:$0x3] %vm347_vm10, %v403_v0 }
 0x18c   :  { %604 = vmatmul.f32.gmra.mxu3 %v420_v7 }
 0x191   :  { %v416_v10 = vld [vmem:[#allocation3 + $0x48] sm:$0xff] }
 0x192   :  { %1236 = vmatmul.msk.f32.gmra.mxu0 %vm494_vm0, %v416_v10  ;;  %v421_v14 = vld [vmem:[#allocation3 + $0x70] sm:$0x3] }
 0x19a   :  { %1237 = vmatmul.msk.f32.gmra.mxu0 %vm494_vm0, %v421_v14 }
 0x1c7   :  { %v521_v18 = vpop.f32.mrf.mxu0 }
 0x1cf   :  { %v524_v22 = vpop.f32.mrf.mxu0 }
 0x1d7   :  { %v527_v32 = vpop.f32.mrf.mxu0 }
 0x1df   :  { %v625_v58 = vpop.f32.mrf.mxu0 }
 0x1ed   :  { %v573_v37 = vpop.f32.mrf.mxu2 }
 0x1f5   :  { %v599_v49 = vpop.f32.mrf.mxu3  ;;  %v576_v1 = vpop.f32.mrf.mxu2 }
 0x1f7   :  { %v547_v26 = vpop.f32.mrf.mxu1 }
 0x1f8   :  { %v548_v60 = vadd.f32 %v547_v26, %v521_v18 }
 0x1fa   :  { %v574_v41 = vadd.f32 %v573_v37, %v548_v60 }
 0x1fc   :  { %v600_v46 = vadd.f32 %v599_v49, %v574_v41 }
 0x1fd   :  { %v579_v29 = vpop.f32.mrf.mxu2 }
 0x1fe   :  { %v626_v31 = vadd.f32 %v625_v58, %v600_v46 }
 0x1ff   :  { %v550_v51 = vpop.f32.mrf.mxu1 }
 0x200   :  { %v551_v35 = vadd.f32 %v550_v51, %v524_v22  ;;  %v634_v21 = vsel %vm494_vm0, %v626_v31, 0.0 }
 0x202   :  { %v577_v55 = vadd.f32 %v576_v1, %v551_v35 }
 0x207   :  { %v602_v2 = vpop.f32.mrf.mxu3  ;;  %v553_v30 = vpop.f32.mrf.mxu1 }
 0x208   :  { %v603_v63 = vadd.f32 %v602_v2, %v577_v55  ;;  %v554_v47 = vadd.f32 %v553_v30, %v527_v32  ;;  %v1879_v55 = vld [vmem:[%s2045_s2] sm:$0x1] }
 0x20a   :  { %v580_v24 = vadd.f32 %v579_v29, %v554_v47 }
 0x20f   :  { %v628_v56 = vpop.f32.mrf.mxu0  ;;  %v605_v48 = vpop.f32.mrf.mxu3 }
 0x210   :  { %v629_v39 = vadd.f32 %v628_v56, %v603_v63  ;;  %v606_v3 = vadd.f32 %v605_v48, %v580_v24 }
 0x212   :  { %v635_v50 = vsel %vm494_vm0, %v629_v39, 0.0 }
 0x213   :  { %v636_v38 = vadd.f32 %v635_v50, %v634_v21 }
 0x217   :  { %v631_v52 = vpop.f32.mrf.mxu0 }
 0x218   :  { %v632_v53 = vadd.f32 %v631_v52, %v606_v3 }
 0x21a   :  { %v637_v17 = vsel %vm347_vm10, %v632_v53, 0.0 }
 0x21b   :  { %v638_v54 = vadd.f32 %v637_v17, %v636_v38 }
 0x21d   :  { %v639_v33 = vrot.slane %v638_v54, 4 }
 0x21f   :  { %v640_v36 = vadd.f32 %v639_v33, %v638_v54 }
 0x221   :  { %v641_v40 = vrot.slane %v640_v36, 2 }
 0x223   :  { %v642_v57 = vadd.f32 %v641_v40, %v640_v36 }
 0x225   :  { %v643_v43 = vrot.slane %v642_v57, 1 }
 0x227   :  { %v644_v19 = vadd.f32 %v643_v43, %v642_v57 }
 0x229   :  { %v652_v23 = vmul.f32 %v651_v44, %v644_v19 }
 0x22b   :  { %v653_v28 = vsub.f32 %v626_v31, %v652_v23  ;;  %v654_v59 = vsub.f32 %v629_v39, %v652_v23  ;;  %v655_v61 = vsub.f32 %v632_v53, %v652_v23  ;;  %v1885_v39 = vld [vmem:[%s2045_s2 + $0x1] ss:$0 sm:$0xff] }
 0x22d   :  { %v656_v62 = vmul.f32 %v653_v28, %v653_v28  ;;  %v657_v0 = vmul.f32 %v654_v59, %v654_v59  ;;  %v658_v4 = vmul.f32 %v655_v61, %v655_v61 }
 0x22f   :  { %v659_v7 = vsel %vm494_vm0, %v656_v62, 0.0  ;;  %v660_v10 = vsel %vm494_vm0, %v657_v0, 0.0  ;;  %v662_v18 = vsel %vm347_vm10, %v658_v4, 0.0 }
 0x230   :  { %v661_v14 = vadd.f32 %v660_v10, %v659_v7 }
 0x232   :  { %v663_v22 = vadd.f32 %v662_v18, %v661_v14  ;;  %v2063_v18 = vld [vmem:[#allocation7_spill] sm:$0xff] }
 0x234   :  { %v664_v26 = vrot.slane %v663_v22, 4 }
 0x236   :  { %v665_v32 = vadd.f32 %v664_v26, %v663_v22  ;;  %v2064_v26 = vld [vmem:[#allocation8_spill] sm:$0xff] }
 0x238   :  { %v666_v37 = vrot.slane %v665_v32, 2 }
 0x23a   :  { %v667_v49 = vadd.f32 %v666_v37, %v665_v32  ;;  %v2065_v32 = vld [vmem:[#allocation9_spill] sm:$0xff] }
 0x23c   :  { %v668_v51 = vrot.slane %v667_v49, 1 }
 0x23e   :  { %v669_v58 = vadd.f32 %v668_v51, %v667_v49  ;;  %v2066_v51 = vld [vmem:[#allocation10_spill] sm:$0xff] }
 0x240   :  { %v670_v60 = vmul.f32 %v669_v58, %v651_v44  ;;  %v2067_v58 = vld [vmem:[#allocation11_spill] sm:$0xff] }
 0x242   :  { %v671_v1 = vadd.f32 1e-05, %v670_v60 }
 0x244   :  { %1265 = vrsqrt.f32 %v671_v1  ;;  %vm678_vm3 = vweird.f32 %v671_v1 }
 0x24a   :  { %v1266_v2 = vpop.eup %1265 }
 0x24b   :  { %v673_v35 = vmul.f32 %v1266_v2, %v671_v1  ;;  %vm679_vm2 = vweird.f32 %v1266_v2 }
 0x24c   :  { %vm680_vm4 = vmor %vm678_vm3, %vm679_vm2 }
 0x24d   :  { %v674_v41 = vmul.f32 %v1266_v2, %v673_v35 }
 0x24f   :  { %v675_v30 = vmul.f32 0.5, %v674_v41 }
 0x251   :  { %v676_v13 = vsub.f32 1.5, %v675_v30 }
 0x253   :  { %v677_v56 = vmul.f32 %v1266_v2, %v676_v13 }
 0x255   :  { %v681_v46 = vsel %vm680_vm4, %v1266_v2, %v677_v56  ;;  %v1273_v56 = vmov 2.0  }
 0x256   :  { %v682_v63 = vmul.f32 %v681_v46, %v1879_v55  ;;  %1267 = vrcp.f32 %v1273_v56  ;;  %v1112_v56 = vld [vmem:[%s2043_s0 + $0x10] sm:$0xff] }
 0x258   :  { %v683_v47 = vperm.slane %v682_v63, 0 }
 0x25a   :  { %v684_v25 = vmul.f32 %v683_v47, %v653_v28  ;;  %v685_v29 = vmul.f32 %v683_v47, %v654_v59  ;;  %v686_v48 = vmul.f32 %v683_v47, %v655_v61 }
 0x25c   :  { %v688_v24 = vadd.f32 %v1885_v39, %v684_v25  ;;  %v689_v31 = vadd.f32 %v1885_v39, %v685_v29  ;;  %v690_v3 = vadd.f32 %v1885_v39, %v686_v48  ;;  %v1268_v25 = vpop.eup %1267 }
 0x25d   :  { %vm1050_vm6 = vweird.f32 %v1268_v25 }
 0x25e   :  { %v691_v50 = vmax.f32 %v688_v24, 0.0  ;;  %v692_v45 = vmax.f32 %v689_v31, 0.0  ;;  %v693_v52 = vmax.f32 %v690_v3, 0.0  ;;  %v1046_v3 = vmul.f32 2.0, %v1268_v25 }
 0x260   :  { %694 = vst.msk [vmem:[#allocation4] sm:$0xff] %vm494_vm0, %v691_v50 }
 0x261   :  { %695 = vst.msk [vmem:[#allocation4 + $0x8] sm:$0xff] %vm494_vm0, %v692_v45 }
 0x262   :  { %696 = vst.msk [vmem:[#allocation4 + $0x10] sm:$0x3] %vm347_vm10, %v693_v52 }
 0x267   :  { %v712_v17 = vld [vmem:[#allocation4 + $0x1] sm:$0x1]  ;;  %v697_v34 = vld [vmem:[#allocation4] sm:$0x1]  ;;  %v772_v36 = vld [vmem:[#allocation4 + $0x2] sm:$0x1] }
 0x268   :  { %v713_v21 = vld [vmem:[#allocation4 + $0xa] sm:$0x1]  ;;  %v698_v53 = vld [vmem:[#allocation4 + $0x9] sm:$0x1]  ;;  %v773_v38 = vld [vmem:[#allocation4 + $0xb] sm:$0x1] }
 0x269   :  { %v715_v27 = vrot.slane %v713_v21, 7  ;;  %v700_v54 = vrot.slane %v698_v53, 7  ;;  %v775_v33 = vrot.slane %v773_v38, 7  ;;  %v925_v40 = vld [vmem:[#allocation4 + $0xf] sm:$0x1]  ;;  %v1047_v53 = vsub.f32 1.0, %v1046_v3 }
 0x26a   :  { %v927_v44 = vrot.slane %v925_v40, 7  ;;  %v924_v19 = vld [vmem:[#allocation4 + $0x6] sm:$0x1]  ;;  %v811_v23 = vld [vmem:[#allocation4 + $0xc] sm:$0x1] }
 0x26b   :  { %v717_v42 = vsel %vm702_vm5, %v712_v17, %v715_v27  ;;  %v703_v57 = vsel %vm702_vm5, %v697_v34, %v700_v54  ;;  %v777_v43 = vsel %vm702_vm5, %v772_v36, %v775_v33  ;;  %v849_v59 = vld [vmem:[#allocation4 + $0xd] sm:$0x1]  ;;  %v887_v61 = vld [vmem:[#allocation4 + $0xe] sm:$0x1]  ;;  %v813_v62 = vrot.slane %v811_v23, 7 }
 0x26c   :  { %1238 = vmatmul.msk.f32.vlgmr.msrb.gmra.mxu1 %vm494_vm0, %v717_v42  ;;  %1239 = vmatmul.msk.f32.vlgmr.msrb.gmra.mxu2 %vm494_vm0, %v703_v57  ;;  %v929_v28 = vsel %vm702_vm5, %v924_v19, %v927_v44  ;;  %v851_v0 = vrot.slane %v849_v59, 7  ;;  %v889_v4 = vrot.slane %v887_v61, 7  ;;  %v810_v7 = vld [vmem:[#allocation4 + $0x3] sm:$0x1]  ;;  %v848_v10 = vld [vmem:[#allocation4 + $0x4] sm:$0x1]  ;;  %v1048_v27 = vmul.f32 %v1268_v25, %v1047_v53 }
 0x26d   :  { %1240 = vmatmul.msk.f32.vlgmr.msrb.gmra.mxu3 %vm494_vm0, %v777_v43  ;;  %987 = vmatpush.msrb.mxu1 %v1534_v5  ;;  %v815_v5 = vsel %vm702_vm5, %v810_v7, %v813_v62  ;;  %v886_v14 = vld [vmem:[#allocation4 + $0x5] sm:$0x1]  ;;  %v962_v37 = vld [vmem:[#allocation4 + $0x7] sm:$0x1]  ;;  %v1000_v49 = vld [vmem:[#allocation4 + $0x8] sm:$0x1] }
 0x26e   :  { %1244 = vmatmul.msk.f32.vlgmr.msra.gmra.mxu0 %vm494_vm0, %v929_v28  ;;  %1025 = vmatpush.msrb.mxu2 %v1539_v6  ;;  %v853_v6 = vsel %vm702_vm5, %v848_v10, %v851_v0  ;;  %v1049_v34 = vadd.f32 %v1268_v25, %v1048_v27  ;;  %v1274_v7 = vmov 0   ;;  %v1114_v3 = vld [vmem:[%s2043_s0 + $0x20] sm:$0xff] }
 0x26f   :  { %988 = vmatpush.msrb.mxu1 %v1553_v8  ;;  %v891_v8 = vsel %vm702_vm5, %v886_v14, %v889_v4  ;;  %1253 = vset.pattern.permute.xlu1 %v1274_v7 }
 0x270   :  { %1026 = vmatpush.msrb.mxu2 %v1558_v9  ;;  %v963_v9 = vld [vmem:[#allocation4 + $0x10] sm:$0x1]  ;;  %v1051_v42 = vsel %vm1050_vm6, %v1268_v25, %v1049_v34  ;;  %1254 = vset.pattern.permute.xlu0 %v1274_v7 }
 0x271   :  { %989 = vmatpush.msrb.mxu1 %v1570_v11  ;;  %v1001_v11 = vld [vmem:[#allocation4 + $0x11] sm:$0x1] }
 0x272   :  { %1027 = vmatpush.msrb.mxu2 %v1575_v12  ;;  %v2061_v12 = vld [vmem:[#allocation5_spill] sm:$0xff]  ;;  %v1003_v22 = vrot.slane %v1001_v11, 7 }
 0x273   :  { %990 = vmatpush.msrb.mxu1 %v1586_v15  ;;  %v2062_v15 = vld [vmem:[#allocation6_spill] sm:$0xff] }
 0x274   :  { %1028 = vmatpush.msrb.mxu2 %v1594_v16  ;;  %1241 = vmatmul.msk.f32.vlgmr.msra.gmra.mxu1 %vm494_vm0, %v815_v5  ;;  %v965_v16 = vrot.slane %v963_v9, 7  ;;  %v1005_v60 = vsel %vm702_vm5, %v1000_v49, %v1003_v22 }
 0x275   :  { %1242 = vmatmul.msk.f32.vlgmr.msra.gmra.mxu2 %vm494_vm0, %v853_v6  ;;  %1243 = vmatmul.msk.f32.vlgmr.msra.gmra.mxu3 %vm494_vm0, %v891_v8 }
 0x276   :  { %991 = vmatpush.msrb.mxu1 %v1610_v20  ;;  %1029 = vmatpush.msrb.mxu2 %v2061_v12  ;;  %v967_v20 = vsel %vm702_vm5, %v962_v37, %v965_v16 }
 0x278   :  { %992 = vmatpush.msrb.mxu1 %v2062_v15  ;;  %1030 = vmatpush.msrb.mxu2 %v2063_v18 }
 0x27a   :  { %993 = vmatpush.msrb.mxu1 %v2064_v26  ;;  %1031 = vmatpush.msrb.mxu2 %v2065_v32 }
 0x27c   :  { %994 = vmatpush.msrb.mxu1 %v2066_v51  ;;  %1032 = vmatpush.msrb.mxu2 %v2067_v58  ;;  %v1275_v58 = vmov 1  }
 0x27d   :  { %1245 = vmatmul.msk.f32.vlgmr.msrb.gmra.mxu1 %vm494_vm0, %v967_v20  ;;  %1246 = vmatmul.msk.f32.vlgmr.msrb.gmra.mxu2 %vm494_vm0, %v1005_v60 }
 0x2e9   :  { %v746_v1 = vpop.f32.mrf.mxu1 }
 0x2eb   :  { %v958_v24 = vpop.f32.mrf.mxu0 }
 0x2ef   :  { %v769_v2 = vpop.f32.mrf.mxu2 }
 0x2f0   :  { %v770_v35 = vadd.f32 %v769_v2, %v746_v1  ;;  %v806_v41 = vpop.f32.mrf.mxu3  ;;  %v1110_v1 = vld [vmem:[%s2043_s0] sm:$0xff] }
 0x2f1   :  { %v844_v13 = vpop.f32.mrf.mxu1 }
 0x2f2   :  { %v809_v30 = vadd.f32 %v806_v41, %v770_v35  ;;  %v1111_v41 = vld [vmem:[%s2043_s0 + $0x8] sm:$0xff] }
 0x2f4   :  { %v847_v46 = vadd.f32 %v844_v13, %v809_v30 }
 0x2f8   :  { %v882_v63 = vpop.f32.mrf.mxu2  ;;  %v920_v29 = vpop.f32.mrf.mxu3 }
 0x2f9   :  { %v885_v47 = vadd.f32 %v882_v63, %v847_v46 }
 0x2fa   :  { %v996_v50 = vpop.f32.mrf.mxu1 }
 0x2fb   :  { %v923_v48 = vadd.f32 %v920_v29, %v885_v47  ;;  %v1113_v47 = vld [vmem:[%s2043_s0 + $0x18] sm:$0xff] }
 0x2fd   :  { %v961_v31 = vadd.f32 %v958_v24, %v923_v48  ;;  %v1115_v48 = vld [vmem:[%s2043_s0 + $0x28] sm:$0xff] }
 0x2ff   :  { %v999_v45 = vadd.f32 %v996_v50, %v961_v31 }
 0x300   :  { %v1034_v52 = vpop.f32.mrf.mxu2 }
 0x301   :  { %v1037_v21 = vadd.f32 %v1034_v52, %v999_v45  ;;  %v1175_v52 = vld [vmem:[%s2043_s0 + $0x40] sm:$0xff] }
 0x303   :  { %v1038_v38 = vsel %vm347_vm10, %v1037_v21, 0.0 }
 0x304   :  { %v1039_v17 = vrot.slane %v1038_v38, 4 }
 0x306   :  { %v1040_v54 = vadd.f32 %v1039_v17, %v1038_v38  ;;  %v1176_v38 = vld [vmem:[%s2043_s0 + $0x48] sm:$0xff] }
 0x308   :  { %v1041_v33 = vrot.slane %v1040_v54, 2 }
 0x30a   :  { %v1042_v36 = vadd.f32 %v1041_v33, %v1040_v54  ;;  %v1177_v54 = vld [vmem:[%s2043_s0 + $0x50] sm:$0xff] }
 0x30c   :  { %v1043_v40 = vrot.slane %v1042_v36, 1 }
 0x30e   :  { %v1044_v57 = vadd.f32 %v1043_v40, %v1042_v36  ;;  %v1178_v36 = vld [vmem:[%s2043_s0 + $0x58] sm:$0xff] }
 0x310   :  { %v1052_v43 = vmul.f32 %v1051_v42, %v1044_v57  ;;  %v1179_v57 = vld [vmem:[%s2043_s0 + $0x60] sm:$0xff] }
 0x312   :  { %v1053_v44 = vsub.f32 %v1037_v21, %v1052_v43 }
 0x314   :  { %v1054_v19 = vmul.f32 %v1053_v44, %v1053_v44 }
 0x316   :  { %v1055_v23 = vsel %vm347_vm10, %v1054_v19, 0.0  ;;  %vm1166_vm10 = vcmask 203776   ;;  %v1180_v19 = vld [vmem:[%s2043_s0 + $0x68] sm:$0xff] }
 0x317   :  { %v1056_v28 = vrot.slane %v1055_v23, 4 }
 0x319   :  { %v1057_v59 = vadd.f32 %v1056_v28, %v1055_v23 }
 0x31b   :  { %v1058_v61 = vrot.slane %v1057_v59, 2 }
 0x31d   :  { %v1059_v62 = vadd.f32 %v1058_v61, %v1057_v59  ;;  %v1116_v59 = vld [vmem:[%s2043_s0 + $0x30] sm:$0xff] }
 0x31f   :  { %v1060_v0 = vrot.slane %v1059_v62, 1 }
 0x321   :  { %v1061_v4 = vadd.f32 %v1060_v0, %v1059_v62  ;;  %v1181_v0 = vld [vmem:[%s2043_s0 + $0x70] sm:$0xff] }
 0x323   :  { %v1062_v5 = vmul.f32 %v1061_v4, %v1051_v42 }
 0x325   :  { %v1063_v10 = vadd.f32 1e-05, %v1062_v5  ;;  %v1117_v5 = vld [vmem:[%s2043_s0 + $0x38] sm:$0xff] }
 0x327   :  { %1269 = vrsqrt.f32 %v1063_v10  ;;  %vm1070_vm8 = vweird.f32 %v1063_v10 }
 0x32d   :  { %v1270_v14 = vpop.eup %1269 }
 0x32e   :  { %v1065_v6 = vmul.f32 %v1270_v14, %v1063_v10  ;;  %vm1071_vm7 = vweird.f32 %v1270_v14 }
 0x32f   :  { %vm1072_vm9 = vmor %vm1070_vm8, %vm1071_vm7 }
 0x330   :  { %v1066_v8 = vmul.f32 %v1270_v14, %v1065_v6  ;;  %v1182_v6 = vld [vmem:[%s2043_s0 + $0x78] sm:$0xff] }
 0x332   :  { %v1067_v9 = vmul.f32 0.5, %v1066_v8 }
 0x334   :  { %v1068_v11 = vsub.f32 1.5, %v1067_v9 }
 0x336   :  { %v1069_v12 = vmul.f32 %v1270_v14, %v1068_v11 }
 0x338   :  { %v1073_v15 = vsel %vm1072_vm9, %v1270_v14, %v1069_v12 }
 0x339   :  { %v1074_v18 = vmul.f32 %v1073_v15, %v1879_v55 }
 0x33b   :  { %v1075_v16 = vperm.slane %v1074_v18, 0 }
 0x33d   :  { %v1076_v22 = vmul.f32 %v1075_v16, %v1053_v44 }
 0x33f   :  { %v1077_v26 = vadd.f32 %v1885_v39, %v1076_v22 }
 0x341   :  { %1078 = vxpose.xlu2.b32.start.end [1/1] (short) (narrow) %v1077_v26, 64 }
 0x3a3   :  { %1255 = vset.pattern.permute.xlu2 %v1274_v7 }
 0x3da   :  { %v1094_v32 = vpop.trf.xlu2 }
 0x3db   :  { %1120 = vperm.xlu1 %1253, %v1094_v32  }
 0x3e2   :  { %v1095_v37 = vpop.trf.xlu2 }
 0x3e3   :  { %1125 = vperm.xlu1 %1253, %v1095_v37  }
 0x3ea   :  { %v1096_v49 = vpop.trf.xlu2 }
 0x3eb   :  { %1130 = vperm.xlu0 %1254, %v1096_v49  }
 0x3f2   :  { %v1097_v51 = vpop.trf.xlu2 }
 0x3f3   :  { %1135 = vperm.xlu1 %1253, %v1097_v51   ;;  %1261 = vset.pattern.permute.xlu0 %v1275_v58 }
 0x3fa   :  { %v1098_v20 = vpop.trf.xlu2 }
 0x3fb   :  { %1140 = vperm.xlu1 %1253, %v1098_v20  }
 0x402   :  { %v1099_v55 = vpop.trf.xlu2 }
 0x403   :  { %1256 = vset.pattern.permute.xlu1 %v1275_v58  ;;  %1145 = vperm.xlu2 %1255, %v1099_v55  }
 0x404   :  { %1184 = vperm.xlu1 %1256, %v1094_v32  }
 0x40a   :  { %v1100_v39 = vpop.trf.xlu2 }
 0x40c   :  { %1188 = vperm.xlu1 %1256, %v1095_v37  }
 0x412   :  { %v1101_v60 = vpop.trf.xlu2 }
 0x414   :  { %1192 = vperm.xlu1 %1256, %v1096_v49  }
 0x41c   :  { %1196 = vperm.xlu1 %1256, %v1097_v51  }
 0x424   :  { %1200 = vperm.xlu1 %1256, %v1098_v20  }
 0x42c   :  { %1204 = vperm.xlu1 %1256, %v1099_v55  }
 0x434   :  { %1257 = vset.pattern.permute.xlu1 %v1274_v7 }
 0x435   :  { %1150 = vperm.xlu1 %1257, %v1100_v39  }
 0x43d   :  { %1258 = vset.pattern.permute.xlu1 %v1275_v58 }
 0x43e   :  { %1208 = vperm.xlu1 %1258, %v1100_v39  }
 0x446   :  { %1259 = vset.pattern.permute.xlu1 %v1274_v7 }
 0x447   :  { %1155 = vperm.xlu1 %1259, %v1101_v60  }
 0x44d   :  { %v1121_v2 = vpop.permute.xlu1 %1120 }
 0x44e   :  { %v1158_v35 = vadd.f32 %v1121_v2, %v1110_v1 }
 0x44f   :  { %1260 = vset.pattern.permute.xlu1 %v1275_v58 }
 0x450   :  { %1167 = vst.msk [vmem:[%s2046_s3] sm:$0xff] %vm1166_vm10, %v1158_v35  ;;  %1212 = vperm.xlu1 %1260, %v1101_v60  }
 0x455   :  { %v1126_v30 = vpop.permute.xlu1 %1125 }
 0x456   :  { %v1159_v13 = vadd.f32 %v1126_v30, %v1111_v41 }
 0x458   :  { %1168 = vst.msk [vmem:[%s2046_s3 + $0x8] sm:$0xff] %vm1166_vm10, %v1159_v13 }
 0x45d   :  { %v1131_v46 = vpop.permute.xlu0 %1130  ;;  %v1146_v24 = vpop.permute.xlu2 %1145 }
 0x45e   :  { %v1160_v63 = vadd.f32 %v1131_v46, %v1112_v56  ;;  %v1163_v31 = vadd.f32 %v1146_v24, %v1115_v48 }
 0x460   :  { %1169 = vst.msk [vmem:[%s2046_s3 + $0x10] sm:$0xff] %vm1166_vm10, %v1160_v63 }
 0x461   :  { %1172 = vst.msk [vmem:[%s2046_s3 + $0x28] sm:$0xff] %vm1166_vm10, %v1163_v31 }
 0x465   :  { %v1136_v25 = vpop.permute.xlu1 %1135 }
 0x466   :  { %v1161_v29 = vadd.f32 %v1136_v25, %v1113_v47 }
 0x468   :  { %1170 = vst.msk [vmem:[%s2046_s3 + $0x18] sm:$0xff] %vm1166_vm10, %v1161_v29 }
 0x46d   :  { %v1141_v50 = vpop.permute.xlu1 %1140 }
 0x46e   :  { %v1162_v45 = vadd.f32 %v1141_v50, %v1114_v3 }
 0x470   :  { %1171 = vst.msk [vmem:[%s2046_s3 + $0x20] sm:$0xff] %vm1166_vm10, %v1162_v45 }
 0x476   :  { %v1185_v21 = vpop.permute.xlu1 %1184 }
 0x477   :  { %v1215_v53 = vadd.f32 %v1185_v21, %v1175_v52 }
 0x479   :  { %1223 = vst.msk [vmem:[%s2046_s3 + $0x40] sm:$0xff] %vm1166_vm10, %v1215_v53 }
 0x47e   :  { %v1189_v17 = vpop.permute.xlu1 %1188 }
 0x47f   :  { %v1216_v27 = vadd.f32 %v1189_v17, %v1176_v38 }
 0x481   :  { %1224 = vst.msk [vmem:[%s2046_s3 + $0x48] sm:$0xff] %vm1166_vm10, %v1216_v27 }
 0x486   :  { %v1193_v33 = vpop.permute.xlu1 %1192 }
 0x487   :  { %v1217_v34 = vadd.f32 %v1193_v33, %v1177_v54 }
 0x489   :  { %1225 = vst.msk [vmem:[%s2046_s3 + $0x50] sm:$0xff] %vm1166_vm10, %v1217_v34 }
 0x48e   :  { %v1197_v40 = vpop.permute.xlu1 %1196 }
 0x48f   :  { %v1218_v42 = vadd.f32 %v1197_v40, %v1178_v36 }
 0x491   :  { %1226 = vst.msk [vmem:[%s2046_s3 + $0x58] sm:$0xff] %vm1166_vm10, %v1218_v42 }
 0x496   :  { %v1201_v43 = vpop.permute.xlu1 %1200 }
 0x497   :  { %v1219_v44 = vadd.f32 %v1201_v43, %v1179_v57 }
 0x499   :  { %1227 = vst.msk [vmem:[%s2046_s3 + $0x60] sm:$0xff] %vm1166_vm10, %v1219_v44 }
 0x49e   :  { %v1205_v23 = vpop.permute.xlu1 %1204 }
 0x49f   :  { %v1220_v28 = vadd.f32 %v1205_v23, %v1180_v19 }
 0x4a1   :  { %1228 = vst.msk [vmem:[%s2046_s3 + $0x68] sm:$0xff] %vm1166_vm10, %v1220_v28 }
 0x4a7   :  { %v1151_v61 = vpop.permute.xlu1 %1150 }
 0x4a8   :  { %v1164_v62 = vadd.f32 %v1151_v61, %v1116_v59 }
 0x4aa   :  { %1173 = vst.msk [vmem:[%s2046_s3 + $0x30] sm:$0xff] %vm1166_vm10, %v1164_v62 }
 0x4b0   :  { %v1209_v4 = vpop.permute.xlu1 %1208 }
 0x4b1   :  { %v1221_v7 = vadd.f32 %v1209_v4, %v1181_v0 }
 0x4b3   :  { %1229 = vst.msk [vmem:[%s2046_s3 + $0x70] sm:$0xff] %vm1166_vm10, %v1221_v7 }
 0x4b9   :  { %v1156_v10 = vpop.permute.xlu1 %1155 }
 0x4ba   :  { %v1165_v14 = vadd.f32 %v1156_v10, %v1117_v5 }
 0x4bc   :  { %1174 = vst.msk [vmem:[%s2046_s3 + $0x38] sm:$0xff] %vm1166_vm10, %v1165_v14 }
 0x4c2   :  { %v1213_v8 = vpop.permute.xlu1 %1212 }
 0x4c3   :  { %v1222_v9 = vadd.f32 %v1213_v8, %v1182_v6 }
 0x4c5   :  { %1230 = vst.msk [vmem:[%s2046_s3 + $0x78] sm:$0xff] %vm1166_vm10, %v1222_v9 }

</bundles_post_ra>
